<compile_context>
chip_gen: v7x
topology: tpu7x:2x2x1
jax: 0.10.0
libtpu: 0.0.40
codegen_flags: <defaults>
</compile_context>

<pallas_src>
import functools

import jax
import jax.numpy as jnp
from jax import lax
from jax.experimental import pallas as pl
from jax.experimental.pallas import tpu as pltpu


def _layer_norm(x, gamma, beta, eps=1e-5):
    mu = jnp.mean(x, axis=-1, keepdims=True)
    var = jnp.mean((x - mu) ** 2, axis=-1, keepdims=True)
    return (x - mu) * lax.rsqrt(var + eps) * gamma + beta


# ----------------------------- Pallas kernel -----------------------------

def encoder_kernel(x_ref, pos_ref,
                   wqk_ref, bqk_ref, wv_ref, bv_ref, wo_ref, bo_ref,
                   w1_ref, b1_ref, w2_ref, b2_ref,
                   g1_ref, be1_ref, g2_ref, be2_ref,
                   out_ref, x_scr, *, nhead, ffn_chunk):
    """One (batch, layer) grid step of the fused encoder."""
    layer = pl.program_id(1)
    n_layers = pl.num_programs(1)
    bf16 = jnp.bfloat16

    # Layer 0: pull this batch element's activation into the VMEM carry;
    # subsequent layers reuse the scratch (no HBM round-trip per layer).
    @pl.when(layer == 0)
    def _():
        x_scr[...] = x_ref[0].astype(jnp.float32)

    x = x_scr[...]                          # (S, D) f32 carry
    pos = pos_ref[0].astype(jnp.float32)    # (S, D)
    S, D = x.shape
    dh = D // nhead
    scale = 1.0 / (dh ** 0.5)

    # ---- projections (bf16 operands, f32 accumulation) ----
    qk_in = (x + pos).astype(bf16)
    x_bf = x.astype(bf16)
    # Fused Q/K projection: wrapper pre-transposed & concatenated -> (D, 2D).
    qk = jnp.dot(qk_in, wqk_ref[0],
                 preferred_element_type=jnp.float32) + bqk_ref[0]
    v = jnp.dot(x_bf, wv_ref[0],
                preferred_element_type=jnp.float32) + bv_ref[0]
    q = qk[:, :D].astype(bf16)
    k = qk[:, D:].astype(bf16)
    v_bf = v.astype(bf16)
    wo = wo_ref[0]                          # (D, D) bf16

    # ---- multi-head attention ----
    # Static head loop; scores contract last dims directly (no K transpose).
    # The per-head slice of W_o is folded in so each head accumulates into a
    # full-width lane-dense (S, D) f32 value (no masked sub-lane scratch
    # stores).  TODO(synk): batch the per-head QK^T / PV matmuls into one
    # head-batched dot_general once attention is flash-tiled.
    contract_last = (((1,), (1,)), ((), ()))
    attn = jnp.zeros((S, D), jnp.float32)
    for h in range(nhead):
        sl = slice(h * dh, (h + 1) * dh)
        qh = q[:, sl]                        # (S, dh) bf16
        kh = k[:, sl]
        vh = v_bf[:, sl]
        s = lax.dot_general(qh, kh, contract_last,
                            preferred_element_type=jnp.float32) * scale  # (S,S)
        s = s - jnp.max(s, axis=-1, keepdims=True)
        p = jnp.exp(s)
        p = p * pl.reciprocal(jnp.sum(p, axis=-1, keepdims=True), approx=True)
        oh = jnp.dot(p.astype(bf16), vh,
                     preferred_element_type=jnp.float32)                 # (S,dh)
        attn = attn + jnp.dot(oh.astype(bf16), wo[sl, :],
                              preferred_element_type=jnp.float32)        # (S,D)
    attn = attn + bo_ref[0]

    # residual + LayerNorm 1 (f32)
    x1 = _layer_norm(x + attn, g1_ref[0], be1_ref[0])
    x1_bf = x1.astype(bf16)

    # ---- FFN, chunked over the sequence dim ----
    w1 = w1_ref[0]                           # (D, dff) bf16
    w2 = w2_ref[0]                           # (dff, D) bf16
    b1 = b1_ref[0]
    b2 = b2_ref[0]
    g2 = g2_ref[0]
    be2 = be2_ref[0]
    n_chunks = S // ffn_chunk
    for c in range(n_chunks):
        rows = slice(c * ffn_chunk, (c + 1) * ffn_chunk)
        ff = jnp.dot(x1_bf[rows, :], w1,
                     preferred_element_type=jnp.float32) + b1
        ff = jnp.maximum(ff, 0.0)
        ff = jnp.dot(ff.astype(bf16), w2,
                     preferred_element_type=jnp.float32) + b2
        # residual + LayerNorm 2; carry to the next layer chunk-by-chunk.
        x_scr[rows, :] = _layer_norm(x1[rows, :] + ff, g2, be2)

    # Flush to HBM only once per batch element.
    @pl.when(layer == n_layers - 1)
    def _():
        out_ref[0] = x_scr[...].astype(out_ref.dtype)


# ----------------------------- JAX wrapper --------------------------------

_WEIGHT_ORDER = ("wqk_t", "bqk", "wv_t", "bv", "wo_t", "bo",
                 "w1_t", "b1", "w2_t", "b2", "g1", "be1", "g2", "be2")


def _pack_layer_params(layer_params):
    """Stack per-layer PyTorch-layout weights along a leading layer axis.

    Pre-transposes every weight (nn.Linear: y = x @ W.T + b), fuses the Q and
    K projection weights/biases, and casts matmul weights to bf16 (biases and
    LayerNorm params stay f32; accumulation in-kernel is f32).
    """
    bf16 = jnp.bfloat16

    def stack(fn, dtype=None):
        w = jnp.stack([fn(p) for p in layer_params], axis=0)
        return w.astype(dtype) if dtype is not None else w

    return {
        "wqk_t": stack(lambda p: jnp.concatenate([p["wq"].T, p["wk"].T], -1), bf16),
        "bqk":   stack(lambda p: jnp.concatenate([p["bq"], p["bk"]], -1)),
        "wv_t":  stack(lambda p: p["wv"].T, bf16),
        "bv":    stack(lambda p: p["bv"]),
        "wo_t":  stack(lambda p: p["wo"].T, bf16),
        "bo":    stack(lambda p: p["bo"]),
        "w1_t":  stack(lambda p: p["w1"].T, bf16),
        "b1":    stack(lambda p: p["b1"]),
        "w2_t":  stack(lambda p: p["w2"].T, bf16),
        "b2":    stack(lambda p: p["b2"]),
        "g1":    stack(lambda p: p["g1"]),
        "be1":   stack(lambda p: p["be1"]),
        "g2":    stack(lambda p: p["g2"]),
        "be2":   stack(lambda p: p["be2"]),
    }


def _pick_ffn_chunk(S):
    if S <= 256:
        return S
    for c in (256, 128, 64, 32, 16, 8):
        if S % c == 0:
            return c
    return S


def transformer_encoder_pallas(src, pos, layer_params, nhead, norm=None):
    """TransformerEncoder.forward on (B, S, D) activations, fully fused."""
    B, S, D = src.shape
    L = len(layer_params)
    packed = _pack_layer_params(layer_params)
    weights = [packed[n] for n in _WEIGHT_ORDER]
    dff = packed["w1_t"].shape[-1]
    ffn_chunk = _pick_ffn_chunk(S)

    act_spec = pl.BlockSpec((1, S, D), lambda b, l: (b, 0, 0))
    w_specs = [pl.BlockSpec((1,) + w.shape[1:], lambda b, l: (l, 0, 0))
               for w in weights]

    flops = B * L * (8 * S * D * D + 4 * S * S * D + 4 * S * D * dff)
    transcendentals = B * L * (nhead * S * S + 4 * S)
    # Weights are re-streamed once per batch element with grid=(B, L).
    bytes_accessed = (3 * B * S * D * src.dtype.itemsize
                      + B * sum(int(w.size) * w.dtype.itemsize for w in weights))

    kernel = functools.partial(encoder_kernel, nhead=nhead, ffn_chunk=ffn_chunk)
    out = pl.pallas_call(
        kernel,
        out_shape=jax.ShapeDtypeStruct((B, S, D), src.dtype),
        grid_spec=pltpu.PrefetchScalarGridSpec(
            num_scalar_prefetch=0,
            grid=(B, L),                              # batch outer, layer inner
            in_specs=[act_spec, act_spec] + w_specs,
            out_specs=act_spec,
            scratch_shapes=[pltpu.VMEM((S, D), jnp.float32)],  # activation carry
        ),
        compiler_params=pltpu.CompilerParams(
            dimension_semantics=("parallel", "arbitrary"),
            vmem_limit_bytes=48 * 1024 * 1024),
        cost_estimate=pl.CostEstimate(flops=flops,
                                      transcendentals=transcendentals,
                                      bytes_accessed=bytes_accessed),
    )(src, pos, *weights)

    if norm is not None:
        # DETR post-norm encoder passes norm=None; plain-JAX epilogue if given.
        out = _layer_norm(out, norm["g"], norm["b"])
    return out


# -------------------------- pure-JAX reference ---------------------------

def encoder_layer_ref(x, pos, p, nhead):
    B, S, D = x.shape
    dh = D // nhead
    qk = x + pos
    q = qk @ p["wq"].T + p["bq"]
    k = qk @ p["wk"].T + p["bk"]
    v = x @ p["wv"].T + p["bv"]

    def split_heads(t):
        return t.reshape(B, S, nhead, dh).transpose(0, 2, 1, 3)

    qh, kh, vh = split_heads(q), split_heads(k), split_heads(v)
    s = jnp.einsum("bhqd,bhkd->bhqk", qh, kh) / jnp.sqrt(dh)
    a = jax.nn.softmax(s, axis=-1)
    o = jnp.einsum("bhqk,bhkd->bhqd", a, vh).transpose(0, 2, 1, 3).reshape(B, S, D)
    o = o @ p["wo"].T + p["bo"]
    x1 = _layer_norm(x + o, p["g1"], p["be1"])
    ff = jax.nn.relu(x1 @ p["w1"].T + p["b1"]) @ p["w2"].T + p["b2"]
    return _layer_norm(x1 + ff, p["g2"], p["be2"])


def transformer_encoder_ref(src, pos, layer_params, nhead):
    out = src
    for p in layer_params:
        out = encoder_layer_ref(out, pos, p, nhead)
    return out


# ------------------------------- params ----------------------------------

def init_layer_params(key, d_model, dim_ff):
    ks = jax.random.split(key, 10)
    s = 0.05
    f32 = jnp.float32
    return {
        "wq": jax.random.normal(ks[0], (d_model, d_model), f32) * s,
        "wk": jax.random.normal(ks[1], (d_model, d_model), f32) * s,
        "wv": jax.random.normal(ks[2], (d_model, d_model), f32) * s,
        "bq": jax.random.normal(ks[3], (1, d_model), f32) * s,
        "bk": jax.random.normal(ks[4], (1, d_model), f32) * s,
        "bv": jax.random.normal(ks[5], (1, d_model), f32) * s,
        "wo": jax.random.normal(ks[6], (d_model, d_model), f32) * s,
        "bo": jnp.zeros((1, d_model), f32),
        "w1": jax.random.normal(ks[7], (dim_ff, d_model), f32) * s,
        "b1": jax.random.normal(ks[8], (1, dim_ff), f32) * s,
        "w2": jax.random.normal(ks[9], (d_model, dim_ff), f32) * s,
        "b2": jnp.zeros((1, d_model), f32),
        "g1": jnp.ones((1, d_model), f32),
        "be1": jnp.zeros((1, d_model), f32),
        "g2": jnp.ones((1, d_model), f32),
        "be2": jnp.zeros((1, d_model), f32),
    }


# -------------------------------- main ------------------------------------

if __name__ == "__main__":
    B, S, D = 2, 16, 32          # batch, sequence (H*W tokens), d_model
    NHEAD, DIM_FF, NUM_LAYERS = 4, 64, 2

    root = jax.random.PRNGKey(0)
    k_src, k_pos, k_layers = jax.random.split(root, 3)
    src = jax.random.normal(k_src, (B, S, D), jnp.float32)
    pos = jax.random.normal(k_pos, (B, S, D), jnp.float32)

    layer_keys = jax.random.split(k_layers, NUM_LAYERS)
    layer_params = [init_layer_params(k, D, DIM_FF) for k in layer_keys]

    out = transformer_encoder_pallas(src, pos, layer_params, NHEAD, norm=None)
    out = jax.block_until_ready(out)

    ref = transformer_encoder_ref(src, pos, layer_params, NHEAD)
    ref = jax.block_until_ready(ref)

    assert out.shape == (B, S, D)
    # Tolerance accounts for bf16 matmul operands (f32 accumulation) and the
    # EUP approximate reciprocal in the softmax; structural bugs would produce
    # O(0.1-1) errors.
    assert jnp.allclose(out, ref, rtol=2e-2, atol=2e-2), (
        f"max abs err {jnp.max(jnp.abs(out - ref))}")

    print("KERNEL_OK")
</pallas_src>

<mosaic_0001>
module attributes {stable_mosaic.version = 11 : i64} {
  func.func @encoder_kernel(%arg0: i32, %arg1: i32, %arg2: memref<1x16x32xf32, #tpu.memory_space<vmem>>, %arg3: memref<1x16x32xf32, #tpu.memory_space<vmem>>, %arg4: memref<1x32x64xbf16, #tpu.memory_space<vmem>>, %arg5: memref<1x1x64xf32, #tpu.memory_space<vmem>>, %arg6: memref<1x32x32xbf16, #tpu.memory_space<vmem>>, %arg7: memref<1x1x32xf32, #tpu.memory_space<vmem>>, %arg8: memref<1x32x32xbf16, #tpu.memory_space<vmem>>, %arg9: memref<1x1x32xf32, #tpu.memory_space<vmem>>, %arg10: memref<1x32x64xbf16, #tpu.memory_space<vmem>>, %arg11: memref<1x1x64xf32, #tpu.memory_space<vmem>>, %arg12: memref<1x64x32xbf16, #tpu.memory_space<vmem>>, %arg13: memref<1x1x32xf32, #tpu.memory_space<vmem>>, %arg14: memref<1x1x32xf32, #tpu.memory_space<vmem>>, %arg15: memref<1x1x32xf32, #tpu.memory_space<vmem>>, %arg16: memref<1x1x32xf32, #tpu.memory_space<vmem>>, %arg17: memref<1x1x32xf32, #tpu.memory_space<vmem>>, %arg18: memref<1x16x32xf32, #tpu.memory_space<vmem>>, %arg19: memref<16x32xf32, #tpu.memory_space<vmem>>) attributes {dimension_semantics = [#tpu.dimension_semantics<parallel>, #tpu.dimension_semantics<arbitrary>], iteration_bounds = array<i64: 2, 2>, scalar_prefetch = 0 : i64, scratch_operands = 1 : i64, tpu.core_type = #tpu.core_type<tc>, window_params = [{transform_indices = @transform_0, window_bounds = array<i64: 1, 16, 32>}, {transform_indices = @transform_1, window_bounds = array<i64: 1, 16, 32>}, {transform_indices = @transform_2, window_bounds = array<i64: 1, 32, 64>}, {transform_indices = @transform_3, window_bounds = array<i64: 1, 1, 64>}, {transform_indices = @transform_4, window_bounds = array<i64: 1, 32, 32>}, {transform_indices = @transform_5, window_bounds = array<i64: 1, 1, 32>}, {transform_indices = @transform_6, window_bounds = array<i64: 1, 32, 32>}, {transform_indices = @transform_7, window_bounds = array<i64: 1, 1, 32>}, {transform_indices = @transform_8, window_bounds = array<i64: 1, 32, 64>}, {transform_indices = @transform_9, window_bounds = array<i64: 1, 1, 64>}, {transform_indices = @transform_10, window_bounds = array<i64: 1, 64, 32>}, {transform_indices = @transform_11, window_bounds = array<i64: 1, 1, 32>}, {transform_indices = @transform_12, window_bounds = array<i64: 1, 1, 32>}, {transform_indices = @transform_13, window_bounds = array<i64: 1, 1, 32>}, {transform_indices = @transform_14, window_bounds = array<i64: 1, 1, 32>}, {transform_indices = @transform_15, window_bounds = array<i64: 1, 1, 32>}, {transform_indices = @transform_16, window_bounds = array<i64: 1, 16, 32>}]} {
    %c0_i32 = arith.constant 0 : i32
    %0 = arith.cmpi eq, %arg1, %c0_i32 : i32
    %1 = arith.extui %0 : i1 to i32
    %c0_i32_0 = arith.constant 0 : i32
    %2 = arith.cmpi ne, %1, %c0_i32_0 : i32
    scf.if %2 {
      %c0_89 = arith.constant 0 : index
      %c0_90 = arith.constant 0 : index
      %c0_91 = arith.constant 0 : index
      %199 = vector.load %arg2[%c0_89, %c0_90, %c0_91] : memref<1x16x32xf32, #tpu.memory_space<vmem>>, vector<1x16x32xf32>
      %200 = vector.shape_cast %199 : vector<1x16x32xf32> to vector<16x32xf32>
      %c0_92 = arith.constant 0 : index
      %c0_93 = arith.constant 0 : index
      %201 = vector.load %arg19[%c0_92, %c0_93] : memref<16x32xf32, #tpu.memory_space<vmem>>, vector<16x32xf32>
      tpu.vector_store %arg19[%c0_92, %c0_93], %200 {strides = array<i32>} : memref<16x32xf32, #tpu.memory_space<vmem>>, vector<16x32xf32>,
    } else {
    }
    %c0 = arith.constant 0 : index
    %c0_1 = arith.constant 0 : index
    %3 = vector.load %arg19[%c0, %c0_1] : memref<16x32xf32, #tpu.memory_space<vmem>>, vector<16x32xf32>
    %c0_2 = arith.constant 0 : index
    %c0_3 = arith.constant 0 : index
    %c0_4 = arith.constant 0 : index
    %4 = vector.load %arg3[%c0_2, %c0_3, %c0_4] : memref<1x16x32xf32, #tpu.memory_space<vmem>>, vector<1x16x32xf32>
    %5 = vector.shape_cast %4 : vector<1x16x32xf32> to vector<16x32xf32>
    %6 = arith.addf %3, %5 : vector<16x32xf32>
    %7 = arith.truncf %6 : vector<16x32xf32> to vector<16x32xbf16>
    %8 = arith.truncf %3 : vector<16x32xf32> to vector<16x32xbf16>
    %c0_5 = arith.constant 0 : index
    %c0_6 = arith.constant 0 : index
    %c0_7 = arith.constant 0 : index
    %9 = vector.load %arg4[%c0_5, %c0_6, %c0_7] : memref<1x32x64xbf16, #tpu.memory_space<vmem>>, vector<1x32x64xbf16>
    %10 = vector.shape_cast %9 : vector<1x32x64xbf16> to vector<32x64xbf16>
    %cst = arith.constant dense<0.000000e+00> : vector<16x64xf32>
    %11 = tpu.matmul %7, %10, %cst {dimension_numbers = #tpu.dot_dimension_numbers<[1], [0], [0], [1], [0, 0, 1, 1], [], []>} : vector<16x32xbf16>, vector<32x64xbf16>, vector<16x64xf32> -> vector<16x64xf32>
    %c0_8 = arith.constant 0 : index
    %c0_9 = arith.constant 0 : index
    %c0_10 = arith.constant 0 : index
    %12 = vector.load %arg5[%c0_8, %c0_9, %c0_10] : memref<1x1x64xf32, #tpu.memory_space<vmem>>, vector<1x1x64xf32>
    %13 = vector.shape_cast %12 : vector<1x1x64xf32> to vector<1x64xf32>
    %14 = vector.broadcast %13 : vector<1x64xf32> to vector<16x64xf32>
    %15 = arith.addf %11, %14 : vector<16x64xf32>
    %c0_11 = arith.constant 0 : index
    %c0_12 = arith.constant 0 : index
    %c0_13 = arith.constant 0 : index
    %16 = vector.load %arg6[%c0_11, %c0_12, %c0_13] : memref<1x32x32xbf16, #tpu.memory_space<vmem>>, vector<1x32x32xbf16>
    %17 = vector.shape_cast %16 : vector<1x32x32xbf16> to vector<32x32xbf16>
    %cst_14 = arith.constant dense<0.000000e+00> : vector<16x32xf32>
    %18 = tpu.matmul %8, %17, %cst_14 {dimension_numbers = #tpu.dot_dimension_numbers<[1], [0], [0], [1], [0, 0, 1, 1], [], []>} : vector<16x32xbf16>, vector<32x32xbf16>, vector<16x32xf32> -> vector<16x32xf32>
    %c0_15 = arith.constant 0 : index
    %c0_16 = arith.constant 0 : index
    %c0_17 = arith.constant 0 : index
    %19 = vector.load %arg7[%c0_15, %c0_16, %c0_17] : memref<1x1x32xf32, #tpu.memory_space<vmem>>, vector<1x1x32xf32>
    %20 = vector.shape_cast %19 : vector<1x1x32xf32> to vector<1x32xf32>
    %21 = vector.broadcast %20 : vector<1x32xf32> to vector<16x32xf32>
    %22 = arith.addf %18, %21 : vector<16x32xf32>
    %23 = vector.extract_strided_slice %15 {offsets = [0, 0], sizes = [16, 32], strides = [1, 1]} : vector<16x64xf32> to vector<16x32xf32>
    %24 = arith.truncf %23 : vector<16x32xf32> to vector<16x32xbf16>
    %25 = vector.extract_strided_slice %15 {offsets = [0, 32], sizes = [16, 32], strides = [1, 1]} : vector<16x64xf32> to vector<16x32xf32>
    %26 = arith.truncf %25 : vector<16x32xf32> to vector<16x32xbf16>
    %27 = arith.truncf %22 : vector<16x32xf32> to vector<16x32xbf16>
    %c0_18 = arith.constant 0 : index
    %c0_19 = arith.constant 0 : index
    %c0_20 = arith.constant 0 : index
    %28 = vector.load %arg8[%c0_18, %c0_19, %c0_20] : memref<1x32x32xbf16, #tpu.memory_space<vmem>>, vector<1x32x32xbf16>
    %29 = vector.shape_cast %28 : vector<1x32x32xbf16> to vector<32x32xbf16>
    %cst_21 = arith.constant 0.000000e+00 : f32
    %30 = vector.broadcast %cst_21 : f32 to vector<16x32xf32>
    %31 = vector.extract_strided_slice %24 {offsets = [0, 0], sizes = [16, 8], strides = [1, 1]} : vector<16x32xbf16> to vector<16x8xbf16>
    %32 = vector.extract_strided_slice %26 {offsets = [0, 0], sizes = [16, 8], strides = [1, 1]} : vector<16x32xbf16> to vector<16x8xbf16>
    %33 = vector.extract_strided_slice %27 {offsets = [0, 0], sizes = [16, 8], strides = [1, 1]} : vector<16x32xbf16> to vector<16x8xbf16>
    %cst_22 = arith.constant dense<0.000000e+00> : vector<16x16xf32>
    %34 = tpu.matmul %31, %32, %cst_22 {dimension_numbers = #tpu.dot_dimension_numbers<[1], [1], [0], [0], [0, 0, 1, 0], [], []>} : vector<16x8xbf16>, vector<16x8xbf16>, vector<16x16xf32> -> vector<16x16xf32>
    %cst_23 = arith.constant 0.353553385 : f32
    %35 = vector.broadcast %cst_23 : f32 to vector<16x16xf32>
    %36 = arith.mulf %34, %35 : vector<16x16xf32>
    %cst_24 = arith.constant dense<0xFF800000> : vector<16xf32>
    %37 = vector.multi_reduction <maximumf>, %36, %cst_24 [1] : vector<16x16xf32> to vector<16xf32>
    %38 = vector.shape_cast %37 : vector<16xf32> to vector<16x1xf32>
    %39 = vector.broadcast %38 : vector<16x1xf32> to vector<16x16xf32>
    %40 = arith.subf %36, %39 : vector<16x16xf32>
    %41 = math.exp %40 : vector<16x16xf32>
    %cst_25 = arith.constant dense<0.000000e+00> : vector<16xf32>
    %42 = vector.multi_reduction <add>, %41, %cst_25 [1] : vector<16x16xf32> to vector<16xf32>
    %43 = vector.shape_cast %42 : vector<16xf32> to vector<16x1xf32>
    %44 = tpu.reciprocal %43 {approx = true} : vector<16x1xf32> -> vector<16x1xf32>
    %45 = vector.broadcast %44 : vector<16x1xf32> to vector<16x16xf32>
    %46 = arith.mulf %41, %45 : vector<16x16xf32>
    %47 = arith.truncf %46 : vector<16x16xf32> to vector<16x16xbf16>
    %cst_26 = arith.constant dense<0.000000e+00> : vector<16x8xf32>
    %48 = tpu.matmul %47, %33, %cst_26 {dimension_numbers = #tpu.dot_dimension_numbers<[1], [0], [0], [1], [0, 0, 1, 1], [], []>} : vector<16x16xbf16>, vector<16x8xbf16>, vector<16x8xf32> -> vector<16x8xf32>
    %49 = arith.truncf %48 : vector<16x8xf32> to vector<16x8xbf16>
    %50 = vector.extract_strided_slice %29 {offsets = [0, 0], sizes = [8, 32], strides = [1, 1]} : vector<32x32xbf16> to vector<8x32xbf16>
    %cst_27 = arith.constant dense<0.000000e+00> : vector<16x32xf32>
    %51 = tpu.matmul %49, %50, %cst_27 {dimension_numbers = #tpu.dot_dimension_numbers<[1], [0], [0], [1], [0, 0, 1, 1], [], []>} : vector<16x8xbf16>, vector<8x32xbf16>, vector<16x32xf32> -> vector<16x32xf32>
    %52 = arith.addf %30, %51 : vector<16x32xf32>
    %53 = vector.extract_strided_slice %24 {offsets = [0, 8], sizes = [16, 8], strides = [1, 1]} : vector<16x32xbf16> to vector<16x8xbf16>
    %54 = vector.extract_strided_slice %26 {offsets = [0, 8], sizes = [16, 8], strides = [1, 1]} : vector<16x32xbf16> to vector<16x8xbf16>
    %55 = vector.extract_strided_slice %27 {offsets = [0, 8], sizes = [16, 8], strides = [1, 1]} : vector<16x32xbf16> to vector<16x8xbf16>
    %cst_28 = arith.constant dense<0.000000e+00> : vector<16x16xf32>
    %56 = tpu.matmul %53, %54, %cst_28 {dimension_numbers = #tpu.dot_dimension_numbers<[1], [1], [0], [0], [0, 0, 1, 0], [], []>} : vector<16x8xbf16>, vector<16x8xbf16>, vector<16x16xf32> -> vector<16x16xf32>
    %cst_29 = arith.constant 0.353553385 : f32
    %57 = vector.broadcast %cst_29 : f32 to vector<16x16xf32>
    %58 = arith.mulf %56, %57 : vector<16x16xf32>
    %cst_30 = arith.constant dense<0xFF800000> : vector<16xf32>
    %59 = vector.multi_reduction <maximumf>, %58, %cst_30 [1] : vector<16x16xf32> to vector<16xf32>
    %60 = vector.shape_cast %59 : vector<16xf32> to vector<16x1xf32>
    %61 = vector.broadcast %60 : vector<16x1xf32> to vector<16x16xf32>
    %62 = arith.subf %58, %61 : vector<16x16xf32>
    %63 = math.exp %62 : vector<16x16xf32>
    %cst_31 = arith.constant dense<0.000000e+00> : vector<16xf32>
    %64 = vector.multi_reduction <add>, %63, %cst_31 [1] : vector<16x16xf32> to vector<16xf32>
    %65 = vector.shape_cast %64 : vector<16xf32> to vector<16x1xf32>
    %66 = tpu.reciprocal %65 {approx = true} : vector<16x1xf32> -> vector<16x1xf32>
    %67 = vector.broadcast %66 : vector<16x1xf32> to vector<16x16xf32>
    %68 = arith.mulf %63, %67 : vector<16x16xf32>
    %69 = arith.truncf %68 : vector<16x16xf32> to vector<16x16xbf16>
    %cst_32 = arith.constant dense<0.000000e+00> : vector<16x8xf32>
    %70 = tpu.matmul %69, %55, %cst_32 {dimension_numbers = #tpu.dot_dimension_numbers<[1], [0], [0], [1], [0, 0, 1, 1], [], []>} : vector<16x16xbf16>, vector<16x8xbf16>, vector<16x8xf32> -> vector<16x8xf32>
    %71 = arith.truncf %70 : vector<16x8xf32> to vector<16x8xbf16>
    %72 = vector.extract_strided_slice %29 {offsets = [8, 0], sizes = [8, 32], strides = [1, 1]} : vector<32x32xbf16> to vector<8x32xbf16>
    %cst_33 = arith.constant dense<0.000000e+00> : vector<16x32xf32>
    %73 = tpu.matmul %71, %72, %cst_33 {dimension_numbers = #tpu.dot_dimension_numbers<[1], [0], [0], [1], [0, 0, 1, 1], [], []>} : vector<16x8xbf16>, vector<8x32xbf16>, vector<16x32xf32> -> vector<16x32xf32>
    %74 = arith.addf %52, %73 : vector<16x32xf32>
    %75 = vector.extract_strided_slice %24 {offsets = [0, 16], sizes = [16, 8], strides = [1, 1]} : vector<16x32xbf16> to vector<16x8xbf16>
    %76 = vector.extract_strided_slice %26 {offsets = [0, 16], sizes = [16, 8], strides = [1, 1]} : vector<16x32xbf16> to vector<16x8xbf16>
    %77 = vector.extract_strided_slice %27 {offsets = [0, 16], sizes = [16, 8], strides = [1, 1]} : vector<16x32xbf16> to vector<16x8xbf16>
    %cst_34 = arith.constant dense<0.000000e+00> : vector<16x16xf32>
    %78 = tpu.matmul %75, %76, %cst_34 {dimension_numbers = #tpu.dot_dimension_numbers<[1], [1], [0], [0], [0, 0, 1, 0], [], []>} : vector<16x8xbf16>, vector<16x8xbf16>, vector<16x16xf32> -> vector<16x16xf32>
    %cst_35 = arith.constant 0.353553385 : f32
    %79 = vector.broadcast %cst_35 : f32 to vector<16x16xf32>
    %80 = arith.mulf %78, %79 : vector<16x16xf32>
    %cst_36 = arith.constant dense<0xFF800000> : vector<16xf32>
    %81 = vector.multi_reduction <maximumf>, %80, %cst_36 [1] : vector<16x16xf32> to vector<16xf32>
    %82 = vector.shape_cast %81 : vector<16xf32> to vector<16x1xf32>
    %83 = vector.broadcast %82 : vector<16x1xf32> to vector<16x16xf32>
    %84 = arith.subf %80, %83 : vector<16x16xf32>
    %85 = math.exp %84 : vector<16x16xf32>
    %cst_37 = arith.constant dense<0.000000e+00> : vector<16xf32>
    %86 = vector.multi_reduction <add>, %85, %cst_37 [1] : vector<16x16xf32> to vector<16xf32>
    %87 = vector.shape_cast %86 : vector<16xf32> to vector<16x1xf32>
    %88 = tpu.reciprocal %87 {approx = true} : vector<16x1xf32> -> vector<16x1xf32>
    %89 = vector.broadcast %88 : vector<16x1xf32> to vector<16x16xf32>
    %90 = arith.mulf %85, %89 : vector<16x16xf32>
    %91 = arith.truncf %90 : vector<16x16xf32> to vector<16x16xbf16>
    %cst_38 = arith.constant dense<0.000000e+00> : vector<16x8xf32>
    %92 = tpu.matmul %91, %77, %cst_38 {dimension_numbers = #tpu.dot_dimension_numbers<[1], [0], [0], [1], [0, 0, 1, 1], [], []>} : vector<16x16xbf16>, vector<16x8xbf16>, vector<16x8xf32> -> vector<16x8xf32>
    %93 = arith.truncf %92 : vector<16x8xf32> to vector<16x8xbf16>
    %94 = vector.extract_strided_slice %29 {offsets = [16, 0], sizes = [8, 32], strides = [1, 1]} : vector<32x32xbf16> to vector<8x32xbf16>
    %cst_39 = arith.constant dense<0.000000e+00> : vector<16x32xf32>
    %95 = tpu.matmul %93, %94, %cst_39 {dimension_numbers = #tpu.dot_dimension_numbers<[1], [0], [0], [1], [0, 0, 1, 1], [], []>} : vector<16x8xbf16>, vector<8x32xbf16>, vector<16x32xf32> -> vector<16x32xf32>
    %96 = arith.addf %74, %95 : vector<16x32xf32>
    %97 = vector.extract_strided_slice %24 {offsets = [0, 24], sizes = [16, 8], strides = [1, 1]} : vector<16x32xbf16> to vector<16x8xbf16>
    %98 = vector.extract_strided_slice %26 {offsets = [0, 24], sizes = [16, 8], strides = [1, 1]} : vector<16x32xbf16> to vector<16x8xbf16>
    %99 = vector.extract_strided_slice %27 {offsets = [0, 24], sizes = [16, 8], strides = [1, 1]} : vector<16x32xbf16> to vector<16x8xbf16>
    %cst_40 = arith.constant dense<0.000000e+00> : vector<16x16xf32>
    %100 = tpu.matmul %97, %98, %cst_40 {dimension_numbers = #tpu.dot_dimension_numbers<[1], [1], [0], [0], [0, 0, 1, 0], [], []>} : vector<16x8xbf16>, vector<16x8xbf16>, vector<16x16xf32> -> vector<16x16xf32>
    %cst_41 = arith.constant 0.353553385 : f32
    %101 = vector.broadcast %cst_41 : f32 to vector<16x16xf32>
    %102 = arith.mulf %100, %101 : vector<16x16xf32>
    %cst_42 = arith.constant dense<0xFF800000> : vector<16xf32>
    %103 = vector.multi_reduction <maximumf>, %102, %cst_42 [1] : vector<16x16xf32> to vector<16xf32>
    %104 = vector.shape_cast %103 : vector<16xf32> to vector<16x1xf32>
    %105 = vector.broadcast %104 : vector<16x1xf32> to vector<16x16xf32>
    %106 = arith.subf %102, %105 : vector<16x16xf32>
    %107 = math.exp %106 : vector<16x16xf32>
    %cst_43 = arith.constant dense<0.000000e+00> : vector<16xf32>
    %108 = vector.multi_reduction <add>, %107, %cst_43 [1] : vector<16x16xf32> to vector<16xf32>
    %109 = vector.shape_cast %108 : vector<16xf32> to vector<16x1xf32>
    %110 = tpu.reciprocal %109 {approx = true} : vector<16x1xf32> -> vector<16x1xf32>
    %111 = vector.broadcast %110 : vector<16x1xf32> to vector<16x16xf32>
    %112 = arith.mulf %107, %111 : vector<16x16xf32>
    %113 = arith.truncf %112 : vector<16x16xf32> to vector<16x16xbf16>
    %cst_44 = arith.constant dense<0.000000e+00> : vector<16x8xf32>
    %114 = tpu.matmul %113, %99, %cst_44 {dimension_numbers = #tpu.dot_dimension_numbers<[1], [0], [0], [1], [0, 0, 1, 1], [], []>} : vector<16x16xbf16>, vector<16x8xbf16>, vector<16x8xf32> -> vector<16x8xf32>
    %115 = arith.truncf %114 : vector<16x8xf32> to vector<16x8xbf16>
    %116 = vector.extract_strided_slice %29 {offsets = [24, 0], sizes = [8, 32], strides = [1, 1]} : vector<32x32xbf16> to vector<8x32xbf16>
    %cst_45 = arith.constant dense<0.000000e+00> : vector<16x32xf32>
    %117 = tpu.matmul %115, %116, %cst_45 {dimension_numbers = #tpu.dot_dimension_numbers<[1], [0], [0], [1], [0, 0, 1, 1], [], []>} : vector<16x8xbf16>, vector<8x32xbf16>, vector<16x32xf32> -> vector<16x32xf32>
    %118 = arith.addf %96, %117 : vector<16x32xf32>
    %c0_46 = arith.constant 0 : index
    %c0_47 = arith.constant 0 : index
    %c0_48 = arith.constant 0 : index
    %119 = vector.load %arg9[%c0_46, %c0_47, %c0_48] : memref<1x1x32xf32, #tpu.memory_space<vmem>>, vector<1x1x32xf32>
    %120 = vector.shape_cast %119 : vector<1x1x32xf32> to vector<1x32xf32>
    %121 = vector.broadcast %120 : vector<1x32xf32> to vector<16x32xf32>
    %122 = arith.addf %118, %121 : vector<16x32xf32>
    %123 = arith.addf %3, %122 : vector<16x32xf32>
    %c0_49 = arith.constant 0 : index
    %c0_50 = arith.constant 0 : index
    %c0_51 = arith.constant 0 : index
    %124 = vector.load %arg14[%c0_49, %c0_50, %c0_51] : memref<1x1x32xf32, #tpu.memory_space<vmem>>, vector<1x1x32xf32>
    %125 = vector.shape_cast %124 : vector<1x1x32xf32> to vector<1x32xf32>
    %c0_52 = arith.constant 0 : index
    %c0_53 = arith.constant 0 : index
    %c0_54 = arith.constant 0 : index
    %126 = vector.load %arg15[%c0_52, %c0_53, %c0_54] : memref<1x1x32xf32, #tpu.memory_space<vmem>>, vector<1x1x32xf32>
    %127 = vector.shape_cast %126 : vector<1x1x32xf32> to vector<1x32xf32>
    %cst_55 = arith.constant dense<0.000000e+00> : vector<16xf32>
    %128 = vector.multi_reduction <add>, %123, %cst_55 [1] : vector<16x32xf32> to vector<16xf32>
    %129 = vector.shape_cast %128 : vector<16xf32> to vector<16x1xf32>
    %cst_56 = arith.constant 3.200000e+01 : f32
    %130 = vector.broadcast %cst_56 : f32 to vector<16x1xf32>
    %131 = arith.divf %129, %130 : vector<16x1xf32>
    %132 = vector.broadcast %131 : vector<16x1xf32> to vector<16x32xf32>
    %133 = arith.subf %123, %132 : vector<16x32xf32>
    %134 = arith.mulf %133, %133 : vector<16x32xf32>
    %cst_57 = arith.constant dense<0.000000e+00> : vector<16xf32>
    %135 = vector.multi_reduction <add>, %134, %cst_57 [1] : vector<16x32xf32> to vector<16xf32>
    %136 = vector.shape_cast %135 : vector<16xf32> to vector<16x1xf32>
    %cst_58 = arith.constant 3.200000e+01 : f32
    %137 = vector.broadcast %cst_58 : f32 to vector<16x1xf32>
    %138 = arith.divf %136, %137 : vector<16x1xf32>
    %139 = vector.broadcast %131 : vector<16x1xf32> to vector<16x32xf32>
    %140 = arith.subf %123, %139 : vector<16x32xf32>
    %cst_59 = arith.constant 9.99999974E-6 : f32
    %141 = vector.broadcast %cst_59 : f32 to vector<16x1xf32>
    %142 = arith.addf %138, %141 : vector<16x1xf32>
    %143 = math.rsqrt %142 : vector<16x1xf32>
    %144 = vector.broadcast %143 : vector<16x1xf32> to vector<16x32xf32>
    %145 = arith.mulf %140, %144 : vector<16x32xf32>
    %146 = vector.broadcast %125 : vector<1x32xf32> to vector<16x32xf32>
    %147 = arith.mulf %145, %146 : vector<16x32xf32>
    %148 = vector.broadcast %127 : vector<1x32xf32> to vector<16x32xf32>
    %149 = arith.addf %147, %148 : vector<16x32xf32>
    %150 = arith.truncf %149 : vector<16x32xf32> to vector<16x32xbf16>
    %c0_60 = arith.constant 0 : index
    %c0_61 = arith.constant 0 : index
    %c0_62 = arith.constant 0 : index
    %151 = vector.load %arg10[%c0_60, %c0_61, %c0_62] : memref<1x32x64xbf16, #tpu.memory_space<vmem>>, vector<1x32x64xbf16>
    %152 = vector.shape_cast %151 : vector<1x32x64xbf16> to vector<32x64xbf16>
    %c0_63 = arith.constant 0 : index
    %c0_64 = arith.constant 0 : index
    %c0_65 = arith.constant 0 : index
    %153 = vector.load %arg12[%c0_63, %c0_64, %c0_65] : memref<1x64x32xbf16, #tpu.memory_space<vmem>>, vector<1x64x32xbf16>
    %154 = vector.shape_cast %153 : vector<1x64x32xbf16> to vector<64x32xbf16>
    %c0_66 = arith.constant 0 : index
    %c0_67 = arith.constant 0 : index
    %c0_68 = arith.constant 0 : index
    %155 = vector.load %arg11[%c0_66, %c0_67, %c0_68] : memref<1x1x64xf32, #tpu.memory_space<vmem>>, vector<1x1x64xf32>
    %156 = vector.shape_cast %155 : vector<1x1x64xf32> to vector<1x64xf32>
    %c0_69 = arith.constant 0 : index
    %c0_70 = arith.constant 0 : index
    %c0_71 = arith.constant 0 : index
    %157 = vector.load %arg13[%c0_69, %c0_70, %c0_71] : memref<1x1x32xf32, #tpu.memory_space<vmem>>, vector<1x1x32xf32>
    %158 = vector.shape_cast %157 : vector<1x1x32xf32> to vector<1x32xf32>
    %c0_72 = arith.constant 0 : index
    %c0_73 = arith.constant 0 : index
    %c0_74 = arith.constant 0 : index
    %159 = vector.load %arg16[%c0_72, %c0_73, %c0_74] : memref<1x1x32xf32, #tpu.memory_space<vmem>>, vector<1x1x32xf32>
    %160 = vector.shape_cast %159 : vector<1x1x32xf32> to vector<1x32xf32>
    %c0_75 = arith.constant 0 : index
    %c0_76 = arith.constant 0 : index
    %c0_77 = arith.constant 0 : index
    %161 = vector.load %arg17[%c0_75, %c0_76, %c0_77] : memref<1x1x32xf32, #tpu.memory_space<vmem>>, vector<1x1x32xf32>
    %162 = vector.shape_cast %161 : vector<1x1x32xf32> to vector<1x32xf32>
    %cst_78 = arith.constant dense<0.000000e+00> : vector<16x64xf32>
    %163 = tpu.matmul %150, %152, %cst_78 {dimension_numbers = #tpu.dot_dimension_numbers<[1], [0], [0], [1], [0, 0, 1, 1], [], []>} : vector<16x32xbf16>, vector<32x64xbf16>, vector<16x64xf32> -> vector<16x64xf32>
    %164 = vector.broadcast %156 : vector<1x64xf32> to vector<16x64xf32>
    %165 = arith.addf %163, %164 : vector<16x64xf32>
    %cst_79 = arith.constant 0.000000e+00 : f32
    %166 = vector.broadcast %cst_79 : f32 to vector<16x64xf32>
    %167 = arith.maximumf %165, %166 : vector<16x64xf32>
    %168 = arith.truncf %167 : vector<16x64xf32> to vector<16x64xbf16>
    %cst_80 = arith.constant dense<0.000000e+00> : vector<16x32xf32>
    %169 = tpu.matmul %168, %154, %cst_80 {dimension_numbers = #tpu.dot_dimension_numbers<[1], [0], [0], [1], [0, 0, 1, 1], [], []>} : vector<16x64xbf16>, vector<64x32xbf16>, vector<16x32xf32> -> vector<16x32xf32>
    %170 = vector.broadcast %158 : vector<1x32xf32> to vector<16x32xf32>
    %171 = arith.addf %169, %170 : vector<16x32xf32>
    %172 = arith.addf %149, %171 : vector<16x32xf32>
    %cst_81 = arith.constant dense<0.000000e+00> : vector<16xf32>
    %173 = vector.multi_reduction <add>, %172, %cst_81 [1] : vector<16x32xf32> to vector<16xf32>
    %174 = vector.shape_cast %173 : vector<16xf32> to vector<16x1xf32>
    %cst_82 = arith.constant 3.200000e+01 : f32
    %175 = vector.broadcast %cst_82 : f32 to vector<16x1xf32>
    %176 = arith.divf %174, %175 : vector<16x1xf32>
    %177 = vector.broadcast %176 : vector<16x1xf32> to vector<16x32xf32>
    %178 = arith.subf %172, %177 : vector<16x32xf32>
    %179 = arith.mulf %178, %178 : vector<16x32xf32>
    %cst_83 = arith.constant dense<0.000000e+00> : vector<16xf32>
    %180 = vector.multi_reduction <add>, %179, %cst_83 [1] : vector<16x32xf32> to vector<16xf32>
    %181 = vector.shape_cast %180 : vector<16xf32> to vector<16x1xf32>
    %cst_84 = arith.constant 3.200000e+01 : f32
    %182 = vector.broadcast %cst_84 : f32 to vector<16x1xf32>
    %183 = arith.divf %181, %182 : vector<16x1xf32>
    %184 = vector.broadcast %176 : vector<16x1xf32> to vector<16x32xf32>
    %185 = arith.subf %172, %184 : vector<16x32xf32>
    %cst_85 = arith.constant 9.99999974E-6 : f32
    %186 = vector.broadcast %cst_85 : f32 to vector<16x1xf32>
    %187 = arith.addf %183, %186 : vector<16x1xf32>
    %188 = math.rsqrt %187 : vector<16x1xf32>
    %189 = vector.broadcast %188 : vector<16x1xf32> to vector<16x32xf32>
    %190 = arith.mulf %185, %189 : vector<16x32xf32>
    %191 = vector.broadcast %160 : vector<1x32xf32> to vector<16x32xf32>
    %192 = arith.mulf %190, %191 : vector<16x32xf32>
    %193 = vector.broadcast %162 : vector<1x32xf32> to vector<16x32xf32>
    %194 = arith.addf %192, %193 : vector<16x32xf32>
    %c0_86 = arith.constant 0 : index
    %c0_87 = arith.constant 0 : index
    %195 = vector.load %arg19[%c0_86, %c0_87] : memref<16x32xf32, #tpu.memory_space<vmem>>, vector<16x32xf32>
    tpu.vector_store %arg19[%c0_86, %c0_87], %194 {strides = array<i32>} : memref<16x32xf32, #tpu.memory_space<vmem>>, vector<16x32xf32>,
    %c1_i32 = arith.constant 1 : i32
    %196 = arith.cmpi eq, %arg1, %c1_i32 : i32
    %197 = arith.extui %196 : i1 to i32
    %c0_i32_88 = arith.constant 0 : i32
    %198 = arith.cmpi ne, %197, %c0_i32_88 : i32
    scf.if %198 {
      %c0_89 = arith.constant 0 : index
      %c0_90 = arith.constant 0 : index
      %199 = vector.load %arg19[%c0_89, %c0_90] : memref<16x32xf32, #tpu.memory_space<vmem>>, vector<16x32xf32>
      %c0_91 = arith.constant 0 : index
      %c0_92 = arith.constant 0 : index
      %c0_93 = arith.constant 0 : index
      %200 = vector.load %arg18[%c0_91, %c0_92, %c0_93] : memref<1x16x32xf32, #tpu.memory_space<vmem>>, vector<1x16x32xf32>
      %201 = vector.shape_cast %200 : vector<1x16x32xf32> to vector<16x32xf32>
      %202 = vector.shape_cast %199 : vector<16x32xf32> to vector<1x16x32xf32>
      tpu.vector_store %arg18[%c0_91, %c0_92, %c0_93], %202 {strides = array<i32>} : memref<1x16x32xf32, #tpu.memory_space<vmem>>, vector<1x16x32xf32>,
    } else {
    }
    return
  }
  func.func @transform_0(%arg0: i32, %arg1: i32) -> (i32, i32, i32) {
    %c0_i32 = arith.constant 0 : i32
    %c0_i32_0 = arith.constant 0 : i32
    %c0_i32_1 = arith.constant 0 : i32
    return %arg0, %c0_i32, %c0_i32_0 : i32, i32, i32
  }
  func.func @transform_1(%arg0: i32, %arg1: i32) -> (i32, i32, i32) {
    %c0_i32 = arith.constant 0 : i32
    %c0_i32_0 = arith.constant 0 : i32
    %c0_i32_1 = arith.constant 0 : i32
    return %arg0, %c0_i32, %c0_i32_0 : i32, i32, i32
  }
  func.func @transform_2(%arg0: i32, %arg1: i32) -> (i32, i32, i32) {
    %c0_i32 = arith.constant 0 : i32
    %c0_i32_0 = arith.constant 0 : i32
    %c0_i32_1 = arith.constant 0 : i32
    return %arg1, %c0_i32, %c0_i32_0 : i32, i32, i32
  }
  func.func @transform_3(%arg0: i32, %arg1: i32) -> (i32, i32, i32) {
    %c0_i32 = arith.constant 0 : i32
    %c0_i32_0 = arith.constant 0 : i32
    %c0_i32_1 = arith.constant 0 : i32
    return %arg1, %c0_i32, %c0_i32_0 : i32, i32, i32
  }
  func.func @transform_4(%arg0: i32, %arg1: i32) -> (i32, i32, i32) {
    %c0_i32 = arith.constant 0 : i32
    %c0_i32_0 = arith.constant 0 : i32
    %c0_i32_1 = arith.constant 0 : i32
    return %arg1, %c0_i32, %c0_i32_0 : i32, i32, i32
  }
  func.func @transform_5(%arg0: i32, %arg1: i32) -> (i32, i32, i32) {
    %c0_i32 = arith.constant 0 : i32
    %c0_i32_0 = arith.constant 0 : i32
    %c0_i32_1 = arith.constant 0 : i32
    return %arg1, %c0_i32, %c0_i32_0 : i32, i32, i32
  }
  func.func @transform_6(%arg0: i32, %arg1: i32) -> (i32, i32, i32) {
    %c0_i32 = arith.constant 0 : i32
    %c0_i32_0 = arith.constant 0 : i32
    %c0_i32_1 = arith.constant 0 : i32
    return %arg1, %c0_i32, %c0_i32_0 : i32, i32, i32
  }
  func.func @transform_7(%arg0: i32, %arg1: i32) -> (i32, i32, i32) {
    %c0_i32 = arith.constant 0 : i32
    %c0_i32_0 = arith.constant 0 : i32
    %c0_i32_1 = arith.constant 0 : i32
    return %arg1, %c0_i32, %c0_i32_0 : i32, i32, i32
  }
  func.func @transform_8(%arg0: i32, %arg1: i32) -> (i32, i32, i32) {
    %c0_i32 = arith.constant 0 : i32
    %c0_i32_0 = arith.constant 0 : i32
    %c0_i32_1 = arith.constant 0 : i32
    return %arg1, %c0_i32, %c0_i32_0 : i32, i32, i32
  }
  func.func @transform_9(%arg0: i32, %arg1: i32) -> (i32, i32, i32) {
    %c0_i32 = arith.constant 0 : i32
    %c0_i32_0 = arith.constant 0 : i32
    %c0_i32_1 = arith.constant 0 : i32
    return %arg1, %c0_i32, %c0_i32_0 : i32, i32, i32
  }
  func.func @transform_10(%arg0: i32, %arg1: i32) -> (i32, i32, i32) {
    %c0_i32 = arith.constant 0 : i32
    %c0_i32_0 = arith.constant 0 : i32
    %c0_i32_1 = arith.constant 0 : i32
    return %arg1, %c0_i32, %c0_i32_0 : i32, i32, i32
  }
  func.func @transform_11(%arg0: i32, %arg1: i32) -> (i32, i32, i32) {
    %c0_i32 = arith.constant 0 : i32
    %c0_i32_0 = arith.constant 0 : i32
    %c0_i32_1 = arith.constant 0 : i32
    return %arg1, %c0_i32, %c0_i32_0 : i32, i32, i32
  }
  func.func @transform_12(%arg0: i32, %arg1: i32) -> (i32, i32, i32) {
    %c0_i32 = arith.constant 0 : i32
    %c0_i32_0 = arith.constant 0 : i32
    %c0_i32_1 = arith.constant 0 : i32
    return %arg1, %c0_i32, %c0_i32_0 : i32, i32, i32
  }
  func.func @transform_13(%arg0: i32, %arg1: i32) -> (i32, i32, i32) {
    %c0_i32 = arith.constant 0 : i32
    %c0_i32_0 = arith.constant 0 : i32
    %c0_i32_1 = arith.constant 0 : i32
    return %arg1, %c0_i32, %c0_i32_0 : i32, i32, i32
  }
  func.func @transform_14(%arg0: i32, %arg1: i32) -> (i32, i32, i32) {
    %c0_i32 = arith.constant 0 : i32
    %c0_i32_0 = arith.constant 0 : i32
    %c0_i32_1 = arith.constant 0 : i32
    return %arg1, %c0_i32, %c0_i32_0 : i32, i32, i32
  }
  func.func @transform_15(%arg0: i32, %arg1: i32) -> (i32, i32, i32) {
    %c0_i32 = arith.constant 0 : i32
    %c0_i32_0 = arith.constant 0 : i32
    %c0_i32_1 = arith.constant 0 : i32
    return %arg1, %c0_i32, %c0_i32_0 : i32, i32, i32
  }
  func.func @transform_16(%arg0: i32, %arg1: i32) -> (i32, i32, i32) {
    %c0_i32 = arith.constant 0 : i32
    %c0_i32_0 = arith.constant 0 : i32
    %c0_i32_1 = arith.constant 0 : i32
    return %arg0, %c0_i32, %c0_i32_0 : i32, i32, i32
  }
}

</mosaic_0001>

<bundles_post_ra>
// kernel: tpu_custom_call.1
= control target key start
LH: loop header
LB: loop body
LE: loop exit
PB: predicated region body
PF: predicated region fallthrough
CT: control target
= control target key end

     0   :  { %s3730_s0 = inlined_call_operand.vmem [shape: f32[2,16,32], index: 0, kind: input, shape index: {}]   ;;  %s3731_s1 = inlined_call_operand.vmem [shape: f32[2,16,32], index: 1, kind: input, shape index: {}]   ;;  %s3732_s2 = inlined_call_operand.vmem [shape: bf16[2,32,64], index: 2, kind: input, shape index: {}]   ;;  %s3733_s3 = inlined_call_operand.vmem [shape: f32[2,1,64], index: 3, kind: input, shape index: {}]   ;;  %s3734_s4 = inlined_call_operand.hbm [shape: bf16[2,32,32], index: 4, kind: input, shape index: {}]   ;;  %s3735_s5 = inlined_call_operand.vmem [shape: f32[2,1,32], index: 5, kind: input, shape index: {}]   ;;  %s3736_s6 = inlined_call_operand.hbm [shape: bf16[2,32,32], index: 6, kind: input, shape index: {}]   ;;  %s3737_s7 = inlined_call_operand.hbm [shape: f32[2,1,32], index: 7, kind: input, shape index: {}]   ;;  %s3738_s8 = inlined_call_operand.hbm [shape: bf16[2,32,64], index: 8, kind: input, shape index: {}]   ;;  %s3739_s9 = inlined_call_operand.hbm [shape: f32[2,1,64], index: 9, kind: input, shape index: {}]   ;;  %s3740_s10 = inlined_call_operand.vmem [shape: bf16[2,64,32], index: 10, kind: input, shape index: {}]   ;;  %s3741_s11 = inlined_call_operand.vmem [shape: f32[2,1,32], index: 11, kind: input, shape index: {}]   ;;  %s3742_s12 = inlined_call_operand.vmem [shape: f32[2,1,32], index: 12, kind: input, shape index: {}]   ;;  %s3743_s13 = inlined_call_operand.vmem [shape: f32[2,1,32], index: 13, kind: input, shape index: {}]   ;;  %s3744_s14 = inlined_call_operand.vmem [shape: f32[2,1,32], index: 14, kind: input, shape index: {}]   ;;  %s3745_s15 = inlined_call_operand.vmem [shape: f32[2,1,32], index: 15, kind: input, shape index: {}]   ;;  %s3746_s16 = inlined_call_operand.hbm [shape: f32[2,16,32], index: 16, kind: output, shape index: {}]  }
   0x1   :  { %3773 = sst [smem:[#allocation32_spill]] %s3730_s0 }
   0x2   :  { %3774 = sst [smem:[#allocation33_spill]] %s3731_s1 }
   0x3   :  { %3775 = sst [smem:[#allocation34_spill]] %s3732_s2 }
   0x4   :  { %3776 = sst [smem:[#allocation35_spill]] %s3733_s3 }
   0x5   :  { %3777 = sst [smem:[#allocation36_spill]] %s3734_s4 }
   0x6   :  { %3778 = sst [smem:[#allocation37_spill]] %s3735_s5 }
   0x7   :  { %3779 = sst [smem:[#allocation38_spill]] %s3736_s6 }
   0x8   :  { %3780 = sst [smem:[#allocation39_spill]] %s3737_s7 }
   0x9   :  { %3781 = sst [smem:[#allocation40_spill]] %s3738_s8 }
   0xa   :  { %3782 = sst [smem:[#allocation41_spill]] %s3739_s9 }
   0xb   :  { %3783 = sst [smem:[#allocation42_spill]] %s3740_s10 }
   0xc   :  { %3784 = sst [smem:[#allocation43_spill]] %s3741_s11 }
   0xd   :  { %3785 = sst [smem:[#allocation44_spill]] %s3742_s12 }
   0xe   :  { %3786 = sst [smem:[#allocation45_spill]] %s3743_s13 }
   0xf   :  { %3787 = sst [smem:[#allocation46_spill]] %s3744_s14 }
  0x10   :  { %3788 = sst [smem:[#allocation47_spill]] %s3745_s15 }
  0x11   :  { %3789 = sst [smem:[#allocation48_spill]] %s3746_s16 }
  0x12   :  { %21 = vsyncpa [#allocation4], 0 }
  0x13   :  { %23 = vsyncpa [#allocation4 + $0x1], 0 }
  0x14   :  { %24 = vsyncpa [#allocation7], 0 }
  0x15   :  { %26 = vsyncpa [#allocation7 + $0x1], 0 }
  0x16   :  { %27 = vsyncpa [#allocation10], 0 }
  0x17   :  { %29 = vsyncpa [#allocation10 + $0x1], 0 }
  0x18   :  { %30 = vsyncpa [#allocation5], 0 }
  0x19   :  { %32 = vsyncpa [#allocation5 + $0x1], 0  ;;  %s3070_s21 = smov 0   ;;  %s3072_s22 = smov 0  }
  0x1a   :  { %s3074_s23 = smov 0   ;;  %s3076_s24 = smov 0  }
  0x1b   :  { %s3078_s25 = smov 0   ;;  %s3080_s26 = smov 0  }
  0x1c   :  { %s3082_s27 = smov 0   ;;  %s3084_s28 = smov 0  }
  0x1d   :  { %s3086_s29 = smov 0   ;;  %s3088_s30 = smov 0  }
  0x1e   :  { %s3090_s0 = smov 0  }
  0x1f LB: > { %3790 = sst [smem:[#allocation17_spill]] %s2924_s21  ;;  %s3124_s17 = sadd.s32 4294967295, %s2964_s0   ;;  %s2964_s0 = sphi %s3090_s0, %s38_s0   ;;  %s2960_s30 = sphi %s3088_s30, %s3870_s30   ;;  %s2956_s29 = sphi %s3086_s29, %s3869_s29   ;;  %s2952_s28 = sphi %s3084_s28, %s3868_s28   ;;  %s2948_s27 = sphi %s3082_s27, %s3867_s27   ;;  %s2944_s26 = sphi %s3080_s26, %s3866_s26   ;;  %s2940_s25 = sphi %s3078_s25, %s3865_s25   ;;  %s2936_s24 = sphi %s3076_s24, %s3864_s24   ;;  %s2932_s23 = sphi %s3074_s23, %s3863_s23   ;;  %s2928_s22 = sphi %s3072_s22, %s3862_s22   ;;  %s2924_s21 = sphi %s3070_s21, %s3861_s21  }
  0x20   : > { %3791 = sst [smem:[#allocation18_spill]] %s2928_s22  ;;  %s2276_s18 = sadd.s32 4294967294, %s2964_s0  }
  0x21   : > { %3792 = sst [smem:[#allocation19_spill]] %s2932_s23  ;;  %s47_s19 = sadd.s32 1, %s2956_s29 }
  0x22   : > { %3793 = sst [smem:[#allocation20_spill]] %s2940_s25  ;;  %s50_s20 = sadd.s32 1, %s2960_s30 }
  0x23   : > { %3794 = sst [smem:[#allocation21_spill]] %s2944_s26  ;;  %p48_p0 = scmp.ge.s32.totalorder %s47_s19, 2 }
  0x24   : > { %3795 = sst [smem:[#allocation22_spill]] %s2952_s28  ;;  %s161_s16 = sadd.s32 1, %s2944_s26 }
  0x25   : > { %3796 = sst [smem:[#allocation23_spill]] %s2956_s29  ;;  %p168_p1 = scmp.ne.s32.totalorder %s2944_s26, %s2940_s25 }
  0x26   : > { %3797 = sst [smem:[#allocation24_spill]] %s2960_s30  ;;  %p169_p2 = scmp.eq.s32.totalorder %s2964_s0, 0 }
  0x27   : > { %3798 = sst [smem:[#allocation25_spill]] %s2964_s0  ;;  %s3872_s19 = smov (%p48_p0, %s47_s19), 0 }
  0x28   : > { %3799 = sst [smem:[#allocation26_spill]] %s3872_s19  ;;  %s3874_s20 = smov (!%p48_p0, %s50_s20), %s2960_s30 }
  0x29   : > { %s158_s15 = ssub.s32 %s2956_s29, %s3872_s19  ;;  %p3138_p3 = por %p169_p2, %p168_p1 }
  0x2a   : > { %p52_p4 = scmp.ge.s32.totalorder %s3874_s20, 2  ;;  %p159_p5 = scmp.eq.s32.totalorder %s158_s15, 0 }
  0x2b   : > { %p174_p6 = scmp.ne.s32.totalorder %s2940_s25, %s2936_s24  ;;  %p175_p7 = scmp.eq.s32.totalorder %s3124_s17, 0 }
  0x2c   : > { %s3876_s20 = smov (%p52_p4, %s3874_s20), 0  ;;  %s473_s10 = sadd.s32 1, %s2932_s23 }
  0x2d   : > { %3801 = sst [smem:[#allocation27_spill]] %s3876_s20  ;;  %p3149_p8 = por %p175_p7, %p174_p6 }
  0x2e   : > { %s3147_s13 = scalar_select %p159_p5, %s2944_s26, %s161_s16  }
  0x2f   : > { %s3803_s19 = scalar_select %p3149_p8, 1, 0 }
  0x30   : > { %3802 = sst [smem:[#allocation28_spill]] %s3147_s13  ;;  %s470_s12 = ssub.s32 %s2960_s30, %s3876_s20 }
  0x31   : > { %p471_p9 = scmp.eq.s32.totalorder %s470_s12, 0  ;;  %p483_p10 = scmp.ne.s32.totalorder %s2932_s23, %s2928_s22 }
  0x32   : > { %p484_p11 = scmp.eq.s32.totalorder %s3124_s17, 3  ;;  %p489_p13 = scmp.ne.s32.totalorder %s2928_s22, %s2924_s21 }
  0x33   : > { %s3160_s15 = scalar_select %p471_p9, %s2932_s23, %s473_s10  }
  0x34   : > { %p3162_p12 = por %p484_p11, %p483_p10  ;;  %p490_p0 = scmp.eq.s32.totalorder %s2276_s18, 3 }
  0x35   : > { %3804 = sst [smem:[#allocation29_spill]] %s3160_s15  ;;  %p2531_p1 = scmp.lt.s32.totalorder %s2964_s0, 4 }
  0x36   : > { %s3805_s24 = scalar_select %p3162_p12, 1, 0 }
  0x37   : > { %s3170_s16 = sand.u32 1, %s2944_s26   ;;  %p3172_p2 = por %p490_p0, %p489_p13 }
  0x38   : > { %3806 = sst [smem:[#allocation30_spill]] %s3805_s24  ;;  %s3177_s12 = sshll.u32 %s3170_s16, 4 }
  0x39   : > { %s3807_s20 = scalar_select %p3172_p2, 1, 0 }
  0x3a   : > { %s3180_s10 = sshll.u32 %s2956_s29, 8  ;;  %p3184_p4 = pnand %p2531_p1, %p3138_p3 }
  0x3b   : > { %3808 = sst [smem:[#allocation31_spill]] %s3807_s20  ;;  %s3757_s18 = sand.u32 1, %s2964_s0  }
  0x3c   : > { %s3809_s30 = scalar_select %p3184_p4, 1, 0 }
  0x3d   : > { %s3810_s6 = sld [smem:[#allocation38_spill]]  ;;  %s571_s23 = scalar_lea.vmem [#allocation6], %s3177_s12 }
  0x3e   : > { %s578_s20 = sshll.u32 %s571_s23, 4  ;;  %s3201_s14 = scalar_lea.sflag [#allocation7], %s3757_s18  ;;  %s3196_s20 = int_to_ptr.vmem [resolvable:$true] %s578_s20 }
  0x3f   : > { %p3207_p6 = pneg %p3184_p4 }
  0x43   : > { %s3193_s15 = scalar_lea.hbm %s3810_s6, %s3180_s10  ;;  %s2689_s23 = scalar_lea.hbm %s3810_s6, 512 }
  0x44   : > { %s2684_s21 = scalar_lea.hbm %s3193_s15, 256  ;;  %p2690_p10 = scmp.lt.u32.totalorder %s3193_s15, %s3810_s6 }
  0x45   : > { %p2685_p3 = scmp.ne.s32.totalorder %s3193_s15, %s2684_s21  ;;  %p2691_p11 = scmp.lt.u32.totalorder %s2689_s23, %s2684_s21 }
  0x46   : > { %p2693_p0 = scmp.lt.u32.totalorder %s2684_s21, %s3193_s15 }
  0x47   : > { %p2687_p7 = pnand %p3207_p6, %p2685_p3  ;;  %p2692_p13 = por %p2691_p11, %p2690_p10 }
  0x49   : > { %p2688_p9 = pneg %p2687_p7  ;;  %p2694_p1 = por %p2693_p0, %p2692_p13 }
  0x4b   : > { %p2695_p5 = pnand %p2694_p1, %p2688_p9 }
  0x4d   : > { %2698 = shalt.err (!%p2695_p5)
}
  0x4e   : > { %s2699_s18 = scalar_lea.vmem %s3196_s20, 256  ;;  %s2966_s13 = smov [#allocation6]  }
  0x4f   : > { %p2700_p3 = scmp.ne.s32.totalorder %s3196_s20, %s2699_s18  ;;  %s2704_s26 = sshll.u32 %s2966_s13, 4  ;;  %s2705_s26 = int_to_ptr.vmem [resolvable:$false] %s2704_s26 }
  0x50   : > { %s2706_s5 = scalar_lea.vmem %s2705_s26, 512  ;;  %p2707_p12 = scmp.lt.s32.totalorder %s3196_s20, %s2705_s26 }
  0x51   : > { %p2702_p7 = pnand %p2700_p3, %p3207_p6  ;;  %p2708_p8 = scmp.lt.s32.totalorder %s2706_s5, %s2699_s18 }
  0x53   : > { %p2703_p2 = pneg %p2702_p7  ;;  %p2709_p10 = por %p2708_p8, %p2707_p12 }
  0x55   : > { %p2710_p11 = pnand %p2709_p10, %p2703_p2 }
  0x57   : > { %2713 = shalt.err (!%p2710_p11)
}
  0x58   : > { %s3760_s11 = smov 64   ;;  %s3762_s21 = smov 4  }
  0x59   : > { %2517 = dma.hbm_to_vmem [thread:$0]  (!%p3184_p4), %s3193_s15, 256, %s3196_s20, %s3201_s14, %s3760_s11, %s3760_s11, %s3762_s21  }
  0x5a   : > { %p679_p8 = scmp.lt.s32.totalorder %s2964_s0, 5  ;;  %s3812_s8 = sld [smem:[#allocation40_spill]] }
  0x5b   : > { %p3813_p12 = scmp.ge.s32.totalorder %s2964_s0, 1  ;;  %s609_s5 = scalar_lea.vmem [#allocation9], %s3177_s12 }
  0x5c   : > { %s616_s6 = sshll.u32 %s609_s5, 4  ;;  %s3815_s20 = sand.u32 1, %s2964_s0   ;;  %s3248_s6 = int_to_ptr.vmem [resolvable:$true] %s616_s6 }
  0x5d   : > { %p3243_p2 = pnand %p3813_p12, %p679_p8  ;;  %s3252_s15 = scalar_lea.sflag [#allocation10], %s3815_s20 }
  0x5f   : > { %s3814_s26 = scalar_select %p3243_p2, 1, 0 }
  0x60   : > { %s3239_s13 = scalar_lea.hbm %s3812_s8, %s3180_s10  ;;  %s2719_s21 = scalar_lea.hbm %s3812_s8, 512 }
  0x61   : > { %s2714_s11 = scalar_lea.hbm %s3239_s13, 256  ;;  %p2720_p0 = scmp.lt.u32.totalorder %s3239_s13, %s3812_s8 }
  0x62   : > { %p2715_p5 = scmp.ne.s32.totalorder %s3239_s13, %s2714_s11  ;;  %p2721_p1 = scmp.lt.u32.totalorder %s2719_s21, %s2714_s11 }
  0x63   : > { %p2723_p7 = scmp.lt.u32.totalorder %s2714_s11, %s3239_s13 }
  0x64   : > { %p2717_p9 = pnand %p2715_p5, %p3207_p6  ;;  %p2722_p3 = por %p2721_p1, %p2720_p0 }
  0x66   : > { %p2718_p13 = pneg %p2717_p9  ;;  %p2724_p10 = por %p2723_p7, %p2722_p3 }
  0x68   : > { %p2725_p11 = pnand %p2724_p10, %p2718_p13 }
  0x6a   : > { %2728 = shalt.err (!%p2725_p11)
}
  0x6b   : > { %s2729_s5 = scalar_lea.vmem %s3248_s6, 256  ;;  %s2969_s20 = smov [#allocation9]  }
  0x6c   : > { %p2730_p8 = scmp.ne.s32.totalorder %s3248_s6, %s2729_s5  ;;  %s2734_s18 = sshll.u32 %s2969_s20, 4  ;;  %s2735_s18 = int_to_ptr.vmem [resolvable:$false] %s2734_s18 }
  0x6d   : > { %s2736_s2 = scalar_lea.vmem %s2735_s18, 512  ;;  %p2737_p9 = scmp.lt.s32.totalorder %s3248_s6, %s2735_s18 }
  0x6e   : > { %p2732_p12 = pnand %p2730_p8, %p3207_p6  ;;  %p2738_p2 = scmp.lt.s32.totalorder %s2736_s2, %s2729_s5 }
  0x70   : > { %p2733_p5 = pneg %p2732_p12  ;;  %p2739_p0 = por %p2738_p2, %p2737_p9 }
  0x72   : > { %p2740_p1 = pnand %p2739_p0, %p2733_p5 }
  0x74   : > { %2743 = shalt.err (!%p2740_p1)
}
  0x75   : > { %s3816_s3 = smov 4   ;;  %s3817_s11 = smov 64  }
  0x76   : > { %2523 = dma.hbm_to_vmem [thread:$0]  (!%p3184_p4), %s3239_s13, 256, %s3248_s6, %s3252_s15, %s3817_s11, %s3817_s11, %s3816_s3  }
  0x77   : > { %s3818_s4 = sld [smem:[#allocation36_spill]]  ;;  %s544_s20 = scalar_lea.vmem [#allocation3], %s3177_s12 }
  0x78   : > { %s551_s18 = sshll.u32 %s544_s20, 4  ;;  %s2285_s2 = sshll.u32 %s2956_s29, 4  ;;  %s3286_s18 = int_to_ptr.vmem [resolvable:$true] %s551_s18 }
  0x79   : > { %s541_s8 = scalar_lea.sflag [#allocation4], %s3170_s16 }
  0x7d   : > { %s3283_s5 = scalar_lea.hbm %s3818_s4, %s3180_s10  ;;  %s2749_s10 = scalar_lea.hbm %s3818_s4, 512 }
  0x7e   : > { %s2744_s0 = scalar_lea.hbm %s3283_s5, 256  ;;  %p2750_p7 = scmp.lt.u32.totalorder %s3283_s5, %s3818_s4 }
  0x7f   : > { %p2745_p2 = scmp.ne.s32.totalorder %s3283_s5, %s2744_s0  ;;  %p2751_p10 = scmp.lt.u32.totalorder %s2749_s10, %s2744_s0 }
  0x80   : > { %p2753_p8 = scmp.lt.u32.totalorder %s2744_s0, %s3283_s5 }
  0x81   : > { %p2747_p13 = pnand %p2745_p2, %p3207_p6  ;;  %p2752_p11 = por %p2751_p10, %p2750_p7 }
  0x83   : > { %p2748_p3 = pneg %p2747_p13  ;;  %p2754_p12 = por %p2753_p8, %p2752_p11 }
  0x85   : > { %p2755_p5 = pnand %p2754_p12, %p2748_p3 }
  0x87   : > { %2758 = shalt.err (!%p2755_p5)
}
  0x88   : > { %s2759_s12 = scalar_lea.vmem %s3286_s18, 256  ;;  %s2970_s20 = smov [#allocation3]  }
  0x89   : > { %p2760_p9 = scmp.ne.s32.totalorder %s3286_s18, %s2759_s12  ;;  %s2764_s6 = sshll.u32 %s2970_s20, 4  ;;  %s2765_s6 = int_to_ptr.vmem [resolvable:$false] %s2764_s6 }
  0x8a   : > { %s2766_s13 = scalar_lea.vmem %s2765_s6, 512  ;;  %p2767_p2 = scmp.lt.s32.totalorder %s3286_s18, %s2765_s6 }
  0x8b   : > { %p2762_p0 = pnand %p2760_p9, %p3207_p6  ;;  %p2768_p13 = scmp.lt.s32.totalorder %s2766_s13, %s2759_s12 }
  0x8d   : > { %p2763_p1 = pneg %p2762_p0  ;;  %p2769_p7 = por %p2768_p13, %p2767_p2 }
  0x8f   : > { %p2770_p10 = pnand %p2769_p7, %p2763_p1 }
  0x91   : > { %2773 = shalt.err (!%p2770_p10)
}
  0x92   : > { %2514 = dma.hbm_to_vmem [thread:$0]  (!%p3184_p4), %s3283_s5, 256, %s3286_s18, %s541_s8, %s3817_s11, %s3817_s11, %s3816_s3  }
  0x93   : > { %s3819_s7 = sld [smem:[#allocation39_spill]]  ;;  %s591_s23 = scalar_lea.vmem [#allocation8], %s3170_s16 }
  0x94   : > { %s598_s12 = sshll.u32 %s591_s23, 4  ;;  %s599_s12 = int_to_ptr.vmem [resolvable:$true] %s598_s12 }
  0x99   : > { %s3321_s21 = scalar_lea.hbm %s3819_s7, %s2285_s2  ;;  %s2779_s3 = scalar_lea.hbm %s3819_s7, 32 }
  0x9a   : > { %s2774_s20 = scalar_lea.hbm %s3321_s21, 16  ;;  %p2780_p12 = scmp.lt.u32.totalorder %s3321_s21, %s3819_s7 }
  0x9b   : > { %p2775_p3 = scmp.ne.s32.totalorder %s3321_s21, %s2774_s20  ;;  %p2781_p5 = scmp.lt.u32.totalorder %s2779_s3, %s2774_s20 }
  0x9c   : > { %p2783_p0 = scmp.lt.u32.totalorder %s2774_s20, %s3321_s21 }
  0x9d   : > { %p2777_p11 = pnand %p2775_p3, %p3207_p6  ;;  %p2782_p9 = por %p2781_p5, %p2780_p12 }
  0x9f   : > { %p2778_p8 = pneg %p2777_p11  ;;  %p2784_p1 = por %p2783_p0, %p2782_p9 }
  0xa1   : > { %p2785_p2 = pnand %p2784_p1, %p2778_p8 }
  0xa3   : > { %2788 = shalt.err (!%p2785_p2)
}
  0xa4   : > { %s2789_s18 = scalar_lea.vmem %s599_s12, 16  ;;  %s2971_s13 = smov [#allocation8]  }
  0xa5   : > { %p2790_p13 = scmp.ne.s32.totalorder %s599_s12, %s2789_s18  ;;  %s2794_s0 = sshll.u32 %s2971_s13, 4  ;;  %s2795_s0 = int_to_ptr.vmem [resolvable:$false] %s2794_s0 }
  0xa6   : > { %s2796_s10 = scalar_lea.vmem %s2795_s0, 32  ;;  %p2797_p3 = scmp.lt.s32.totalorder %s599_s12, %s2795_s0 }
  0xa7   : > { %p2792_p7 = pnand %p2790_p13, %p3207_p6  ;;  %p2798_p11 = scmp.lt.s32.totalorder %s2796_s10, %s2789_s18 }
  0xa9   : > { %p2793_p10 = pneg %p2792_p7  ;;  %p2799_p4 = por %p2798_p11, %p2797_p3 }
  0xab   : > { %p2800_p5 = pnand %p2799_p4, %p2793_p10 }
  0xad   : > { %2803 = shalt.err (!%p2800_p5)
}
  0xae   : > { %p3820_p12 = scmp.ne.s32.totalorder %s3809_s30, 0  ;;  %s3821_s9 = sld [smem:[#allocation41_spill]] }
  0xaf   : > { %s629_s8 = scalar_lea.vmem [#allocation11], %s3170_s16 }
  0xb0   : > { %2520 = dma.hbm_to_vmem [thread:$0]  (!%p3820_p12), %s3321_s21, 16, %s599_s12, %s3201_s14  }
  0xb1   : > { %s636_s3 = sshll.u32 %s629_s8, 4  ;;  %s637_s3 = int_to_ptr.vmem [resolvable:$true] %s636_s3 }
  0xb4   : > { %s3347_s6 = scalar_lea.hbm %s3821_s9, %s2285_s2  ;;  %s2809_s21 = scalar_lea.hbm %s3821_s9, 32 }
  0xb5   : > { %s2804_s11 = scalar_lea.hbm %s3347_s6, 16  ;;  %p2810_p0 = scmp.lt.u32.totalorder %s3347_s6, %s3821_s9 }
  0xb6   : > { %p2805_p4 = scmp.ne.s32.totalorder %s3347_s6, %s2804_s11  ;;  %p2811_p1 = scmp.lt.u32.totalorder %s2809_s21, %s2804_s11 }
  0xb7   : > { %p2813_p13 = scmp.lt.u32.totalorder %s2804_s11, %s3347_s6 }
  0xb8   : > { %p2807_p8 = pnand %p2805_p4, %p3207_p6  ;;  %p2812_p2 = por %p2811_p1, %p2810_p0 }
  0xba   : > { %p2808_p9 = pneg %p2807_p8  ;;  %p2814_p7 = por %p2813_p13, %p2812_p2 }
  0xbc   : > { %p2815_p10 = pnand %p2814_p7, %p2808_p9 }
  0xbe   : > { %2818 = shalt.err (!%p2815_p10)
}
  0xbf   : > { %s2819_s16 = scalar_lea.vmem %s637_s3, 16  ;;  %s2972_s2 = smov [#allocation11]  }
  0xc0   : > { %p2820_p3 = scmp.ne.s32.totalorder %s637_s3, %s2819_s16  ;;  %s2824_s13 = sshll.u32 %s2972_s2, 4  ;;  %s2825_s13 = int_to_ptr.vmem [resolvable:$false] %s2824_s13 }
  0xc1   : > { %s2826_s0 = scalar_lea.vmem %s2825_s13, 32  ;;  %p2827_p4 = scmp.lt.s32.totalorder %s637_s3, %s2825_s13 }
  0xc2   : > { %p2822_p11 = pnand %p2820_p3, %p3207_p6  ;;  %p2828_p8 = scmp.lt.s32.totalorder %s2826_s0, %s2819_s16 }
  0xc4   : > { %p2823_p5 = pneg %p2822_p11  ;;  %p2829_p12 = por %p2828_p8, %p2827_p4 }
  0xc6   : > { %p2830_p0 = pnand %p2829_p12, %p2823_p5 }
  0xc8   : > { %2833 = shalt.err (!%p2830_p0)
}
  0xc9   : > { %p3822_p1 = scmp.ne.s32.totalorder %s3809_s30, 0  ;;  %p3823_p9 = scmp.ne.s32.totalorder %s3814_s26, 0 }
  0xca   : > { %s3371_s24 = sand.u32 (!%p3823_p9), 1, %s2940_s25   ;;  %p3824_p6 = scmp.ne.s32.totalorder (!%p3823_p9), %s3803_s19, 0 }
  0xcb   : > { %2526 = dma.hbm_to_vmem [thread:$0]  (!%p3822_p1), %s3347_s6, 16, %s637_s3, %s3252_s15  }
  0xcc   : > { %683 = sbr.rel (%p3823_p9) target bundleno = 3972 (0xf84), region = 84  ;;  %s3374_s10 = sshll.u32 (!%p3823_p9), %s3371_s24, 4 }
  0xcd   : > { %s686_s23 = scalar_lea.sflag (!%p3823_p9), [#allocation4], %s3371_s24 }
  0xd3   : > { %2907 = dma.done.wait (%p3824_p6), %s686_s23, 256  }
  0xd4   : > { %2909 = vsyncadd (%p3824_p6), %s686_s23, 4294967040  ;;  %s694_s30 = sand.u32 1, %s3124_s17   ;;  %s3384_s15 = scalar_lea.vmem [#allocation6], %s3374_s10 }
  0xd5   : > { %s695_s26 = scalar_lea.sflag [#allocation7], %s694_s30 }
  0xd6   : > { %2911 = dma.done.wait (%p3824_p6), %s695_s26, 272  }
  0xd7   : > { %2913 = vsyncadd (%p3824_p6), %s695_s26, 4294967024  ;;  %s712_s8 = scalar_lea.sflag [#allocation10], %s694_s30 }
  0xd8   : > { %2915 = dma.done.wait (%p3824_p6), %s712_s8, 272  }
  0xd9   : > { %2917 = vsyncadd (%p3824_p6), %s712_s8, 4294967024  ;;  %s3768_s17 = sand.u32 1, %s2928_s22   ;;  %p831_p12 = scmp.lt.s32.totalorder %s2952_s28, 1 }
  0xda   : > { %s2294_s11 = sshll.u32 %s3768_s17, 4  ;;  %p841_p2 = scmp.lt.s32.totalorder %s2948_s27, 1 }
  0xdb   : > { %s832_s5 = scalar_select %p831_p12, %s2952_s28, 1 }
  0xdc   : > { %s3403_s14 = scalar_select %p841_p2, %s2948_s27, 1 }
  0xdd   : > { %s2348_s19 = sshll.u32 %s832_s5, 4  ;;  %s3825_s18 = sld [smem:[#allocation32_spill]] }
  0xde   : > { %s3826_s1 = sld [smem:[#allocation33_spill]]  ;;  %s2350_s23 = sshll.u32 %s3403_s14, 4 }
  0xdf   : > { %s3828_s20 = sld [smem:[#allocation34_spill]]  ;;  %s2351_s21 = sshll.u32 %s3403_s14, 5 }
  0xe0   : > { %s3832_s8 = sld [smem:[#allocation44_spill]]  ;;  %s3833_s3 = sld [smem:[#allocation45_spill]] }
  0xe1   : > { %s3834_s5 = sld [smem:[#allocation46_spill]]  ;;  %s3835_s25 = sld [smem:[#allocation47_spill]] }
  0xe2   : > { %s723_s2 = scalar_lea.vmem [#allocation11], %s3371_s24  ;;  %p2303_p13 = scmp.ne.s32.totalorder %s2948_s27, 0 }
  0xe3   : > { %s835_s16 = scalar_lea.vmem %s3825_s18, %s2348_s19  ;;  %vm879_vm0 = vcmask (!%p2303_p13), 261120  }
  0xe4   : > { %s3411_s0 = scalar_lea.vmem %s3826_s1, %s2348_s19  ;;  %s3831_s1 = sld [smem:[#allocation42_spill]]  ;;  %v877_v0 = vld [vmem:[%s835_s16] sm:$0xff] (!%p2303_p13)  ;;  %v878_v1 = vld [vmem:[%s835_s16 + $0x8] sm:$0xff] (!%p2303_p13) }
  0xe5   : > { %s845_s4 = scalar_lea.vmem %s3828_s20, %s2350_s23  ;;  %s3452_s19 = scalar_lea.vmem [#allocation12], %s2294_s11  ;;  %880 = vst.msk [vmem:[#allocation2] sm:$0xff] (!%p2303_p13), %vm879_vm0, %v877_v0  ;;  %881 = vst.msk [vmem:[#allocation2 + $0x8] sm:$0xff] (!%p2303_p13), %vm879_vm0, %v878_v1 }
  0xe6   : > { %s862_s17 = scalar_lea.vmem %s3832_s8, %s3403_s14  ;;  %s865_s23 = scalar_lea.vmem %s3833_s3, %s3403_s14 }
  0xe7   : > { %s868_s29 = scalar_lea.vmem %s3834_s5, %s3403_s14  ;;  %s871_s18 = scalar_lea.vmem %s3835_s25, %s3403_s14 }
  0xe8   : > { %876 = sbr.rel (%p2303_p13) target bundleno = 239 (0xef), region = 108 }
  0xea   : > { %s3433_s22 = scalar_lea.vmem %s3831_s1, %s2351_s21 }
  0xef PF: > { %v2634_v2 = vld [vmem:[%s845_s4] sm:$0xff]   ;;  %v2973_v3 = vmov 0.0   ;;  %v2635_v4 = vld [vmem:[%s845_s4 + $0x8] sm:$0xff]   ;;  %vm2974_vm1 = vmmov 0   ;;  %vm913_vm2 = vcmask 261120   ;;  %s3836_s28 = sld [smem:[#allocation35_spill]] }
  0xf0   : > { %2391 = vmatprep.subr.bf16.mxu0 %v2973_v3  ;;  %2399 = vmatprep.subr.bf16.mxu1 %v2973_v3  ;;  %v3459_v5 = vld [vmem:[#allocation2] sm:$0xff]  ;;  %v3461_v6 = vld [vmem:[#allocation2 + $0x8] sm:$0xff]  ;;  %s2975_s16 = smov 120   ;;  %s3838_s21 = scalar_lea.vmem [#allocation3], %s3374_s10  ;;  %vm1034_vm3 = vcmask 64512   ;;  %vm1084_vm4 = vcmask 130048  }
  0xf1   : > { %2392 = vmatpush3.bf16.msra.mxu0 %v2634_v2  ;;  %2395 = vmatprep.mubr.msk.bf16.mxu0 %vm2974_vm1, %v2973_v3  ;;  %v884_v7 = vld [vmem:[%s3411_s0] sm:$0xff]  ;;  %v885_v8 = vld [vmem:[%s3411_s0 + $0x8] sm:$0xff]  ;;  %s2976_s0 = smov 96   ;;  %s2977_s13 = smov 88   ;;  %v889_v22 = vpack.c.bf16 %v3461_v6, %v3459_v5  ;;  %vm1281_vm5 = vcmask 1043456   ;;  %vm1887_vm6 = vcmask 523264  }
  0xf2   : > { %2393 = vmatprep.subr.bf16.mxu0 %v2973_v3  ;;  %v886_v9 = vadd.f32 %v884_v7, %v3459_v5  ;;  %2403 = vmatprep.mubr.msk.bf16.mxu1 %vm2974_vm1, %v2973_v3  ;;  %v887_v10 = vadd.f32 %v885_v8, %v3461_v6  ;;  %v2636_v20 = vld [vmem:[%s3838_s21] sm:$0xff]   ;;  %s3839_s30 = smov %s3838_s21  ;;  %s3840_s6 = sld [smem:[#allocation37_spill]] }
  0xf3   : > { %2400 = vmatpush3.bf16.msra.mxu1 %v2636_v20  ;;  %v2637_v21 = vld [vmem:[%s3839_s30 + $0x8] sm:$0xff]   ;;  %s2978_s3 = smov 80   ;;  %s2979_s7 = smov 112  }
  0xf4   : > { %v888_v11 = vpack.c.bf16 %v887_v10, %v886_v9  ;;  %2401 = vmatprep.subr.bf16.mxu1 %v2973_v3  ;;  %s2980_s9 = smov 104   ;;  %s2981_s5 = smov 72  }
  0xf5   : > { %2394 = vmatpush3.bf16.msra.mxu0 %v2635_v4  ;;  %s3837_s11 = scalar_lea.vmem %s3836_s28, %s3403_s14  ;;  %s3843_s12 = scalar_lea.vmem [#allocation9], %s3374_s10 }
  0xf6   : > { %2407 = vmatprep.subr.bf16.mxu0 %v2973_v3  ;;  %v2304_v12 = vld [vmem:[%s3837_s11] ss:$0 sm:$0xff]  ;;  %s3844_s25 = smov %s3843_s12  ;;  %p2339_p7 = scmp.ne.s32.totalorder %s2948_s27, 1 }
  0xf7   : > { %2402 = vmatpush3.bf16.msra.mxu1 %v2637_v21 }
  0xf8   : > { %2396 = vmatmul.mubr.msk.bf16.vlgmr.msra.gmra.mrb[0].mxu0 %vm913_vm2, %v888_v11  ;;  %2413 = vmatprep.subr.bf16.mxu1 %v2973_v3  ;;  %s3841_s20 = scalar_lea.vmem %s3840_s6, %s3403_s14 }
  0xf9   : > { %2409 = vmatprep.mubr.msk.bf16.mxu0 %vm2974_vm1, %v2973_v3  ;;  %v2308_v44 = vld [vmem:[%s3841_s20] ss:$0 sm:$0xff] }
  0xfa   : > { %2404 = vmatmul.mubr.msk.bf16.vlgmr.msra.gmra.mrb[0].mxu1 %vm913_vm2, %v889_v22 }
  0xfb   : > { %2415 = vmatprep.mubr.msk.bf16.mxu1 %vm2974_vm1, %v2973_v3 }
 0x1cb   : > { %v951_v13 = vpop.f32.mrb[0].mxu0 }
 0x1cc   : > { %v2397_v14 = vpop.f32.mrb[1].mxu0  ;;  %v952_v16 = vadd.f32 %v2304_v12, %v951_v13 }
 0x1cd   : > { %v954_v15 = vpop.f32.mrb[2].mxu0  ;;  %v1018_v45 = vpop.f32.mrb[0].mxu1 }
 0x1ce   : > { %v955_v17 = vadd.f32 %v2304_v12, %v954_v15  ;;  %v2398_v18 = vpop.f32.mrb[3].mxu0  ;;  %v1019_v46 = vadd.f32 %v2308_v44, %v1018_v45  ;;  %v2405_v47 = vpop.f32.mrb[1].mxu1 }
 0x1cf   : > { %v1021_v48 = vpop.f32.mrb[2].mxu1 }
 0x1d0   : > { %v3479_v19 = vpack.c.bf16 %v955_v17, %v952_v16  ;;  %v1022_v49 = vadd.f32 %v2308_v44, %v1021_v48  ;;  %v2406_v50 = vpop.f32.mrb[3].mxu1 }
 0x1d2   : > { %1153 = vrot.lane.b32.xlu1 %v3479_v19, %s2975_s16  ;;  %1032 = vrot.lane.b32.xlu0 %v3479_v19, %s2976_s0  ;;  %v3516_v51 = vpack.c.bf16 %v1022_v49, %v1019_v46  ;;  %s3847_s0 = sld [smem:[#allocation43_spill]] }
 0x1d4   : > { %2414 = vmatpush3.bf16.msra.mxu1 %v3516_v51 }
 0x1d5   : > { %2425 = vmatprep.subr.bf16.mxu1 %v2973_v3 }
 0x1d6   : > { %1155 = vrot.lane.b32.xlu0 %v3479_v19, %s2977_s13 }
 0x1d8   : > { %s3848_s21 = scalar_lea.vmem %s3847_s0, %s3403_s14 }
 0x244   : > { %v1033_v23 = vpop.permute.xlu0 %1032  ;;  %v1154_v27 = vpop.permute.xlu1 %1153 }
 0x245   : > { %v1039_v24 = vsel %vm1034_vm3, %v1033_v23, 0 }
 0x246   : > { %2408 = vmatpush3.bf16.xpose.msra.mxu0 %v1039_v24 }
 0x247   : > { %2419 = vmatprep.subr.bf16.mxu0 %v2973_v3 }
 0x248   : > { %v1156_v25 = vpop.permute.xlu0 %1155 }
 0x249   : > { %v1161_v26 = vsel %vm1034_vm3, %v1156_v25, 0 }
 0x24d   : > { %2410 = vmatmul.mubr.msk.bf16.vlgmr.msra.gmra.mrb[4].mxu0 %vm1034_vm3, %v3479_v19 }
 0x24e   : > { %2420 = vmatpush3.bf16.xpose.msra.mxu0 %v1161_v26  ;;  %2421 = vmatprep.mubr.msk.bf16.mxu0 %vm2974_vm1, %v2973_v3 }
 0x24f   : > { %2431 = vmatprep.subr.bf16.mxu0 %v2973_v3 }
 0x255   : > { %2422 = vmatmul.mubr.msk.bf16.vlgmr.msra.gmra.mrb[8].mxu0 %vm1034_vm3, %v1154_v27  ;;  %v1027_v27 = vld [vmem:[%s3384_s15] sm:$0xf] }
 0x256   : > { %2433 = vmatprep.mubr.msk.bf16.mxu0 %vm2974_vm1, %v2973_v3 }
 0x320   : > { %v1075_v28 = vpop.f32.mrb[4].mxu0 }
 0x321   : > { %v1082_v29 = vmul.f32 0.35355338, %v1075_v28  ;;  %v2411_v30 = vpop.f32.mrb[5].mxu0  ;;  %v1330_v28 = vsel %vm1281_vm5, %v1027_v27, 0 }
 0x322   : > { %v1078_v31 = vpop.f32.mrb[6].mxu0 }
 0x323   : > { %v1083_v32 = vmul.f32 0.35355338, %v1078_v31  ;;  %v2412_v33 = vpop.f32.mrb[7].mxu0  ;;  %v1085_v34 = vsel %vm1084_vm4, %v1082_v29, -inf }
 0x324   : > { %1086 = vmax.xlane.f32.xlu1 %v1085_v34 }
 0x325   : > { %v1088_v35 = vsel %vm1084_vm4, %v1083_v32, -inf }
 0x326   : > { %1089 = vmax.xlane.f32.xlu0 %v1088_v35 }
 0x328   : > { %v1197_v36 = vpop.f32.mrb[8].mxu0 }
 0x329   : > { %v1204_v37 = vmul.f32 0.35355338, %v1197_v36  ;;  %v2423_v38 = vpop.f32.mrb[9].mxu0 }
 0x32a   : > { %v1200_v39 = vpop.f32.mrb[10].mxu0 }
 0x32b   : > { %v1205_v40 = vmul.f32 0.35355338, %v1200_v39  ;;  %v2424_v41 = vpop.f32.mrb[11].mxu0  ;;  %v1206_v42 = vsel %vm1084_vm4, %v1204_v37, -inf }
 0x32c   : > { %1207 = vmax.xlane.f32.xlu0 %v1206_v42 }
 0x32d   : > { %v1209_v43 = vsel %vm1084_vm4, %v1205_v40, -inf }
 0x32e   : > { %1210 = vmax.xlane.f32.xlu1 %v1209_v43 }
 0x3b1   : > { %v1087_v52 = vpop.xlane.xlu1 %1086 }
 0x3b2   : > { %v1091_v53 = vsub.f32 %v1082_v29, %v1087_v52  ;;  %v1028_v29 = vld [vmem:[%s3384_s15 + $0x4] sm:$0xf] }
 0x3b3   : > { %v1090_v54 = vpop.xlane.xlu0 %1089  ;;  %v1283_v30 = vsel %vm1281_vm5, %v1028_v29, 0 }
 0x3b4   : > { %v1093_v55 = vmul.f32 1.442695, %v1091_v53  ;;  %v1092_v56 = vsub.f32 %v1083_v32, %v1090_v54  ;;  %2432 = vmatpush3.bf16.msra.mxu0 %v1283_v30 }
 0x3b5   : > { %2443 = vmatprep.subr.bf16.mxu0 %v2973_v3 }
 0x3b6   : > { %2644 = vpow2.f32 %v1093_v55  ;;  %v1095_v57 = vmul.f32 1.442695, %v1092_v56 }
 0x3b8   : > { %2646 = vpow2.f32 %v1095_v57 }
 0x3b9   : > { %v1208_v58 = vpop.xlane.xlu0 %1207 }
 0x3ba   : > { %v1212_v59 = vsub.f32 %v1204_v37, %v1208_v58 }
 0x3bb   : > { %v1211_v60 = vpop.xlane.xlu1 %1210 }
 0x3bc   : > { %v1214_v61 = vmul.f32 1.442695, %v1212_v59  ;;  %v1213_v62 = vsub.f32 %v1205_v40, %v1211_v60 }
 0x3be   : > { %2648 = vpow2.f32 %v1214_v61  ;;  %v1216_v63 = vmul.f32 1.442695, %v1213_v62 }
 0x3c0   : > { %v2645_v0 = vpop.eup %2644  ;;  %2650 = vpow2.f32 %v1216_v63 }
 0x3c1   : > { %v1097_v1 = vsel %vm1084_vm4, %v2645_v0, 0.0 }
 0x3c2   : > { %v2647_v2 = vpop.eup %2646  ;;  %1098 = vadd.xlane.f32.xlu0 %v1097_v1 }
 0x3c3   : > { %v1100_v4 = vsel %vm1084_vm4, %v2647_v2, 0.0 }
 0x3c4   : > { %1101 = vadd.xlane.f32.xlu1 %v1100_v4 }
 0x3c8   : > { %v2649_v7 = vpop.eup %2648 }
 0x3c9   : > { %v1218_v8 = vsel %vm1084_vm4, %v2649_v7, 0.0 }
 0x3ca   : > { %v2651_v9 = vpop.eup %2650  ;;  %1219 = vadd.xlane.f32.xlu0 %v1218_v8 }
 0x3cb   : > { %v1221_v10 = vsel %vm1084_vm4, %v2651_v9, 0.0 }
 0x3cc   : > { %1222 = vadd.xlane.f32.xlu1 %v1221_v10 }
 0x3dd   : > { %1375 = vrot.lane.b32.xlu1 %v3479_v19, %s2978_s3 }
 0x3e0   : > { %1230 = vrot.lane.b32.xlu0 %v3516_v51, %s2975_s16 }
 0x3e1   : > { %1373 = vrot.lane.b32.xlu1 %v3479_v19, %s2979_s7 }
 0x44f   : > { %v1099_v11 = vpop.xlane.xlu0 %1098 }
 0x450   : > { %2652 = vrcp.f32 %v1099_v11 }
 0x451   : > { %v1102_v12 = vpop.xlane.xlu1 %1101 }
 0x452   : > { %2654 = vrcp.f32 %v1102_v12 }
 0x457   : > { %v1220_v13 = vpop.xlane.xlu0 %1219 }
 0x458   : > { %2656 = vrcp.f32 %v1220_v13 }
 0x459   : > { %v1223_v14 = vpop.xlane.xlu1 %1222 }
 0x45a   : > { %v2653_v15 = vpop.eup %2652  ;;  %2658 = vrcp.f32 %v1223_v14 }
 0x45b   : > { %v1105_v17 = vmul.f32 %v2653_v15, %v2645_v0  ;;  %v1231_v20 = vpop.permute.xlu0 %1230 }
 0x45c   : > { %v2655_v16 = vpop.eup %2654 }
 0x45d   : > { %v1106_v18 = vmul.f32 %v2655_v16, %v2647_v2  ;;  %v1376_v38 = vpop.permute.xlu1 %1375 }
 0x45e   : > { %v1381_v42 = vsel %vm1034_vm3, %v1376_v38, 0 }
 0x45f   : > { %v1107_v21 = vpack.c.bf16 %v1106_v18, %v1105_v17 }
 0x461   : > { %2416 = vmatmul.mubr.msk.bf16.vlgmr.msra.gmra.mrb[4].mxu1 %vm1084_vm4, %v1107_v21  ;;  %v1374_v43 = vpop.permute.xlu1 %1373 }
 0x462   : > { %v2657_v22 = vpop.eup %2656  ;;  %2426 = vmatpush3.bf16.msra.mxu1 %v1231_v20  ;;  %2427 = vmatprep.mubr.msk.bf16.mxu1 %vm2974_vm1, %v2973_v3 }
 0x463   : > { %2437 = vmatprep.subr.bf16.mxu1 %v2973_v3  ;;  %v1226_v24 = vmul.f32 %v2657_v22, %v2649_v7 }
 0x464   : > { %v2659_v23 = vpop.eup %2658 }
 0x465   : > { %v1227_v25 = vmul.f32 %v2659_v23, %v2651_v9  ;;  %v1029_v23 = vld [vmem:[%s3384_s15 + $0x8] sm:$0xf] }
 0x467   : > { %v1228_v26 = vpack.c.bf16 %v1227_v25, %v1226_v24  ;;  %v1501_v24 = vsel %vm1281_vm5, %v1029_v23, 0 }
 0x469   : > { %2428 = vmatmul.mubr.msk.bf16.vlgmr.msra.gmra.mrb[8].mxu1 %vm1084_vm4, %v1228_v26 }
 0x46a   : > { %2439 = vmatprep.mubr.msk.bf16.mxu1 %vm2974_vm1, %v2973_v3  ;;  %2438 = vmatpush3.bf16.msra.mxu1 %v1330_v28 }
 0x46b   : > { %2449 = vmatprep.subr.bf16.mxu1 %v2973_v3 }
 0x534   : > { %v1145_v31 = vpop.f32.mrb[4].mxu1 }
 0x535   : > { %v2417_v32 = vpop.f32.mrb[5].mxu1 }
 0x536   : > { %v1148_v33 = vpop.f32.mrb[6].mxu1 }
 0x537   : > { %v1152_v34 = vpack.c.bf16 %v1148_v33, %v1145_v31  ;;  %v2418_v35 = vpop.f32.mrb[7].mxu1 }
 0x539   : > { %2440 = vmatmul.mubr.msk.bf16.vlgmr.msra.gmra.mrb[12].mxu1 %vm1034_vm3, %v1152_v34 }
 0x53a   : > { %2451 = vmatprep.mubr.msk.bf16.mxu1 %vm2974_vm1, %v2973_v3 }
 0x53c   : > { %v1270_v36 = vpop.f32.mrb[8].mxu1 }
 0x53d   : > { %v2429_v37 = vpop.f32.mrb[9].mxu1 }
 0x53e   : > { %v1273_v39 = vpop.f32.mrb[10].mxu1 }
 0x53f   : > { %v1277_v40 = vpack.c.bf16 %v1273_v39, %v1270_v36  ;;  %v2430_v41 = vpop.f32.mrb[11].mxu1 }
 0x541   : > { %2434 = vmatmul.mubr.msk.bf16.vlgmr.msra.gmra.mrb[12].mxu0 %vm1034_vm3, %v1277_v40 }
 0x542   : > { %2444 = vmatpush3.bf16.xpose.msra.mxu0 %v1381_v42  ;;  %2445 = vmatprep.mubr.msk.bf16.mxu0 %vm2974_vm1, %v2973_v3 }
 0x543   : > { %2455 = vmatprep.subr.bf16.mxu0 %v2973_v3 }
 0x549   : > { %2446 = vmatmul.mubr.msk.bf16.vlgmr.msra.gmra.mrb[16].mxu0 %vm1034_vm3, %v1374_v43 }
 0x54a   : > { %2457 = vmatprep.mubr.msk.bf16.mxu0 %vm2974_vm1, %v2973_v3  ;;  %2456 = vmatpush3.bf16.msra.mxu0 %v1501_v24 }
 0x54b   : > { %2467 = vmatprep.subr.bf16.mxu0 %v2973_v3 }
 0x60c   : > { %v1366_v44 = vpop.f32.mrb[12].mxu1 }
 0x60d   : > { %v2441_v45 = vpop.f32.mrb[13].mxu1 }
 0x60e   : > { %v1369_v46 = vpop.f32.mrb[14].mxu1 }
 0x60f   : > { %v2442_v47 = vpop.f32.mrb[15].mxu1 }
 0x614   : > { %v1319_v48 = vpop.f32.mrb[12].mxu0 }
 0x615   : > { %v3553_v49 = vadd.f32 %v1366_v44, %v1319_v48  ;;  %v2435_v50 = vpop.f32.mrb[13].mxu0  ;;  %v1030_v48 = vld [vmem:[%s3384_s15 + $0xc] sm:$0xf]  ;;  %s3842_s15 = scalar_lea.vmem [#allocation8], %s3371_s24 }
 0x616   : > { %v1322_v52 = vpop.f32.mrb[14].mxu0  ;;  %v1674_v50 = vsel %vm1281_vm5, %v1030_v48, 0 }
 0x617   : > { %v3555_v53 = vadd.f32 %v1369_v46, %v1322_v52  ;;  %v2436_v54 = vpop.f32.mrb[15].mxu0 }
 0x61c   : > { %v1417_v55 = vpop.f32.mrb[16].mxu0 }
 0x61d   : > { %v1424_v56 = vmul.f32 0.35355338, %v1417_v55  ;;  %v2447_v57 = vpop.f32.mrb[17].mxu0 }
 0x61e   : > { %v1420_v58 = vpop.f32.mrb[18].mxu0 }
 0x61f   : > { %v1425_v59 = vmul.f32 0.35355338, %v1420_v58  ;;  %v2448_v60 = vpop.f32.mrb[19].mxu0  ;;  %v1426_v61 = vsel %vm1084_vm4, %v1424_v56, -inf }
 0x620   : > { %1427 = vmax.xlane.f32.xlu0 %v1426_v61 }
 0x621   : > { %v1429_v62 = vsel %vm1084_vm4, %v1425_v59, -inf }
 0x622   : > { %1430 = vmax.xlane.f32.xlu1 %v1429_v62 }
 0x633   : > { %1449 = vrot.lane.b32.xlu1 %v3516_v51, %s2979_s7 }
 0x637   : > { %1546 = vrot.lane.b32.xlu1 %v3479_v19, %s2980_s9 }
 0x6ad   : > { %v1428_v63 = vpop.xlane.xlu0 %1427 }
 0x6ae   : > { %v1432_v0 = vsub.f32 %v1424_v56, %v1428_v63 }
 0x6af   : > { %v1431_v1 = vpop.xlane.xlu1 %1430 }
 0x6b0   : > { %v1434_v2 = vmul.f32 1.442695, %v1432_v0  ;;  %v1433_v4 = vsub.f32 %v1425_v59, %v1431_v1 }
 0x6b2   : > { %2660 = vpow2.f32 %v1434_v2  ;;  %v1436_v7 = vmul.f32 1.442695, %v1433_v4 }
 0x6b3   : > { %v1450_v8 = vpop.permute.xlu1 %1449 }
 0x6b4   : > { %2662 = vpow2.f32 %v1436_v7  ;;  %2450 = vmatpush3.bf16.msra.mxu1 %v1450_v8 }
 0x6b5   : > { %2461 = vmatprep.subr.bf16.mxu1 %v2973_v3 }
 0x6bc   : > { %v2661_v9 = vpop.eup %2660 }
 0x6bd   : > { %v1438_v10 = vsel %vm1084_vm4, %v2661_v9, 0.0 }
 0x6be   : > { %v2663_v11 = vpop.eup %2662  ;;  %1439 = vadd.xlane.f32.xlu0 %v1438_v10 }
 0x6bf   : > { %v1441_v12 = vsel %vm1084_vm4, %v2663_v11, 0.0 }
 0x6c2   : > { %1442 = vadd.xlane.f32.xlu0 %v1441_v12 }
 0x6d8   : > { %1548 = vrot.lane.b32.xlu0 %v3479_v19, %s2981_s5  ;;  %v1547_v19 = vpop.permute.xlu1 %1546 }
 0x74b   : > { %v1440_v13 = vpop.xlane.xlu0 %1439 }
 0x74c   : > { %2664 = vrcp.f32 %v1440_v13 }
 0x74f   : > { %v1443_v14 = vpop.xlane.xlu0 %1442 }
 0x750   : > { %2666 = vrcp.f32 %v1443_v14 }
 0x753   : > { %v1549_v20 = vpop.permute.xlu0 %1548 }
 0x754   : > { %v1554_v22 = vsel %vm1034_vm3, %v1549_v20, 0 }
 0x756   : > { %v2665_v15 = vpop.eup %2664 }
 0x757   : > { %v1446_v17 = vmul.f32 %v2665_v15, %v2661_v9  ;;  %v2324_v9 = vld [vmem:[%s3842_s15] ss:$0 sm:$0xff] }
 0x75a   : > { %v2667_v16 = vpop.eup %2666 }
 0x75b   : > { %v1447_v18 = vmul.f32 %v2667_v16, %v2663_v11 }
 0x75d   : > { %v1448_v21 = vpack.c.bf16 %v1447_v18, %v1446_v17 }
 0x75f   : > { %2452 = vmatmul.mubr.msk.bf16.vlgmr.msra.gmra.mrb[16].mxu1 %vm1084_vm4, %v1448_v21 }
 0x760   : > { %2462 = vmatpush3.bf16.xpose.msra.mxu1 %v1554_v22  ;;  %2463 = vmatprep.mubr.msk.bf16.mxu1 %vm2974_vm1, %v2973_v3 }
 0x761   : > { %2473 = vmatprep.subr.bf16.mxu1 %v2973_v3 }
 0x767   : > { %2464 = vmatmul.mubr.msk.bf16.vlgmr.msra.gmra.mrb[20].mxu1 %vm1034_vm3, %v1547_v19 }
 0x768   : > { %2475 = vmatprep.mubr.msk.bf16.mxu1 %vm2974_vm1, %v2973_v3  ;;  %2474 = vmatpush3.bf16.msra.mxu1 %v1674_v50 }
 0x769   : > { %2487 = vmatprep.subr.bf16.mxu1 %v2973_v3 }
 0x832   : > { %v1489_v25 = vpop.f32.mrb[16].mxu1 }
 0x833   : > { %v2453_v26 = vpop.f32.mrb[17].mxu1 }
 0x834   : > { %v1492_v27 = vpop.f32.mrb[18].mxu1 }
 0x835   : > { %v1496_v28 = vpack.c.bf16 %v1492_v27, %v1489_v25  ;;  %v2454_v29 = vpop.f32.mrb[19].mxu1 }
 0x836   : > { %v2638_v29 = vld [vmem:[%s3843_s12] sm:$0xff]  }
 0x837   : > { %2458 = vmatmul.mubr.msk.bf16.vlgmr.msra.gmra.mrb[20].mxu0 %vm1034_vm3, %v1496_v28 }
 0x838   : > { %2469 = vmatprep.mubr.msk.bf16.mxu0 %vm2974_vm1, %v2973_v3 }
 0x83a   : > { %v1590_v30 = vpop.f32.mrb[20].mxu1 }
 0x83b   : > { %v1597_v31 = vmul.f32 0.35355338, %v1590_v30  ;;  %v2465_v32 = vpop.f32.mrb[21].mxu1  ;;  %v2639_v30 = vld [vmem:[%s3844_s25 + $0x8] sm:$0xff]  }
 0x83c   : > { %v1593_v33 = vpop.f32.mrb[22].mxu1  ;;  %v2641_v32 = vld [vmem:[%s3433_s22 + $0x8] sm:$0xff]  }
 0x83d   : > { %v1598_v34 = vmul.f32 0.35355338, %v1593_v33  ;;  %v2466_v35 = vpop.f32.mrb[23].mxu1  ;;  %v1599_v36 = vsel %vm1084_vm4, %v1597_v31, -inf }
 0x83e   : > { %1600 = vmax.xlane.f32.xlu1 %v1599_v36 }
 0x83f   : > { %v1602_v37 = vsel %vm1084_vm4, %v1598_v34, -inf }
 0x840   : > { %1603 = vmax.xlane.f32.xlu0 %v1602_v37 }
 0x8cb   : > { %v1601_v38 = vpop.xlane.xlu1 %1600 }
 0x8cc   : > { %v1605_v39 = vsub.f32 %v1597_v31, %v1601_v38  ;;  %v2640_v31 = vld [vmem:[%s3433_s22] sm:$0xff]  }
 0x8cd   : > { %v1604_v40 = vpop.xlane.xlu0 %1603 }
 0x8ce   : > { %v1607_v41 = vmul.f32 1.442695, %v1605_v39  ;;  %v1606_v42 = vsub.f32 %v1598_v34, %v1604_v40 }
 0x8d0   : > { %2668 = vpow2.f32 %v1607_v41  ;;  %v1609_v43 = vmul.f32 1.442695, %v1606_v42  ;;  %v2325_v41 = vld [vmem:[%s862_s17] ss:$0 sm:$0xff] }
 0x8d2   : > { %2670 = vpow2.f32 %v1609_v43 }
 0x8da   : > { %v2669_v44 = vpop.eup %2668 }
 0x8db   : > { %v1611_v45 = vsel %vm1084_vm4, %v2669_v44, 0.0 }
 0x8dc   : > { %v2671_v46 = vpop.eup %2670  ;;  %1612 = vadd.xlane.f32.xlu0 %v1611_v45  ;;  %v2326_v45 = vld [vmem:[%s865_s23] ss:$0 sm:$0xff] }
 0x8dd   : > { %v1614_v47 = vsel %vm1084_vm4, %v2671_v46, 0.0 }
 0x8de   : > { %1615 = vadd.xlane.f32.xlu1 %v1614_v47 }
 0x8f2   : > { %1622 = vrot.lane.b32.xlu0 %v3516_v51, %s2980_s9 }
 0x90a   : > { %v1537_v52 = vpop.f32.mrb[20].mxu0 }
 0x90b   : > { %v1544_v54 = vadd.f32 %v1537_v52, %v3553_v49  ;;  %v2459_v55 = vpop.f32.mrb[21].mxu0  ;;  %v2642_v52 = vld [vmem:[%s3433_s22 + $0x10] sm:$0xff]  }
 0x90c   : > { %v1540_v56 = vpop.f32.mrb[22].mxu0  ;;  %v2327_v55 = vld [vmem:[%s723_s2] ss:$0 sm:$0xff] }
 0x90d   : > { %v1545_v57 = vadd.f32 %v1540_v56, %v3555_v53  ;;  %v2460_v58 = vpop.f32.mrb[23].mxu0 }
 0x969   : > { %v1613_v59 = vpop.xlane.xlu0 %1612 }
 0x96a   : > { %2672 = vrcp.f32 %v1613_v59 }
 0x96b   : > { %v1616_v60 = vpop.xlane.xlu1 %1615 }
 0x96c   : > { %2674 = vrcp.f32 %v1616_v60 }
 0x96d   : > { %v1623_v61 = vpop.permute.xlu0 %1622 }
 0x96e   : > { %2468 = vmatpush3.bf16.msra.mxu0 %v1623_v61 }
 0x96f   : > { %2479 = vmatprep.subr.bf16.mxu0 %v2973_v3 }
 0x974   : > { %v2673_v51 = vpop.eup %2672 }
 0x975   : > { %v1619_v63 = vmul.f32 %v2673_v51, %v2669_v44 }
 0x976   : > { %v2675_v62 = vpop.eup %2674 }
 0x977   : > { %v1620_v0 = vmul.f32 %v2675_v62, %v2671_v46 }
 0x979   : > { %v1621_v1 = vpack.c.bf16 %v1620_v0, %v1619_v63 }
 0x97b   : > { %2470 = vmatmul.mubr.msk.bf16.vlgmr.msra.gmra.mrb[24].mxu0 %vm1084_vm4, %v1621_v1 }
 0x97c   : > { %2483 = vmatprep.mubr.msk.bf16.mxu0 %vm2974_vm1, %v2973_v3  ;;  %2480 = vmatpush3.bf16.msra.mxu0 %v2638_v29 }
 0x97d   : > { %2481 = vmatprep.subr.bf16.mxu0 %v2973_v3 }
 0x980   : > { %2482 = vmatpush3.bf16.msra.mxu0 %v2639_v30 }
 0xa4e   : > { %v1662_v49 = vpop.f32.mrb[24].mxu0 }
 0xa4f   : > { %v2471_v53 = vpop.f32.mrb[25].mxu0 }
 0xa50   : > { %v1665_v2 = vpop.f32.mrb[26].mxu0 }
 0xa51   : > { %v1669_v4 = vpack.c.bf16 %v1665_v2, %v1662_v49  ;;  %v2472_v7 = vpop.f32.mrb[27].mxu0 }
 0xa53   : > { %2476 = vmatmul.mubr.msk.bf16.vlgmr.msra.gmra.mrb[24].mxu1 %vm1034_vm3, %v1669_v4 }
 0xa54   : > { %2495 = vmatprep.mubr.msk.bf16.mxu1 %vm2974_vm1, %v2973_v3  ;;  %2488 = vmatpush3.bf16.msra.mxu1 %v2640_v31 }
 0xa55   : > { %2489 = vmatprep.subr.bf16.mxu1 %v2973_v3 }
 0xa58   : > { %2490 = vmatpush3.bf16.msra.mxu1 %v2641_v32 }
 0xa59   : > { %2491 = vmatprep.subr.bf16.mxu1 %v2973_v3 }
 0xa5c   : > { %2492 = vmatpush3.bf16.msra.mxu1 %v2642_v52 }
 0xa5d   : > { %2493 = vmatprep.subr.bf16.mxu1 %v2973_v3  ;;  %v2331_v3 = vld [vmem:[%s3848_s21] ss:$0 sm:$0xff] }
 0xb26   : > { %v1710_v8 = vpop.f32.mrb[24].mxu1 }
 0xb27   : > { %v1717_v10 = vadd.f32 %v1710_v8, %v1544_v54  ;;  %v2477_v11 = vpop.f32.mrb[25].mxu1  ;;  %v2643_v54 = vld [vmem:[%s3433_s22 + $0x18] sm:$0xff]  }
 0xb28   : > { %v1713_v12 = vpop.f32.mrb[26].mxu1  ;;  %2494 = vmatpush3.bf16.msra.mxu1 %v2643_v54 }
 0xb29   : > { %v1726_v13 = vadd.f32 %v2324_v9, %v1717_v10  ;;  %v1718_v14 = vadd.f32 %v1713_v12, %v1545_v57  ;;  %v2478_v15 = vpop.f32.mrb[27].mxu1 }
 0xb2b   : > { %v1727_v16 = vadd.f32 %v2324_v9, %v1718_v14  ;;  %v1728_v17 = vadd.f32 %v1726_v13, %v3459_v5 }
 0xb2d   : > { %v1732_v18 = vsel %vm913_vm2, %v1728_v17, 0.0  ;;  %v1729_v20 = vadd.f32 %v1727_v16, %v3461_v6 }
 0xb2e   : > { %1733 = vadd.xlane.f32.xlu1 %v1732_v18 }
 0xb2f   : > { %v1735_v21 = vsel %vm913_vm2, %v1729_v20, 0.0 }
 0xb32   : > { %1736 = vadd.xlane.f32.xlu1 %v1735_v21 }
 0xbbb   : > { %v1734_v22 = vpop.xlane.xlu1 %1733 }
 0xbbc   : > { %v1739_v19 = vmul.f32 0.03125, %v1734_v22 }
 0xbbe   : > { %v1741_v23 = vsub.f32 %v1728_v17, %v1739_v19 }
 0xbbf   : > { %v1737_v24 = vpop.xlane.xlu1 %1736 }
 0xbc0   : > { %v1740_v25 = vmul.f32 0.03125, %v1737_v24  ;;  %v1743_v26 = vmul.f32 %v1741_v23, %v1741_v23 }
 0xbc2   : > { %v1742_v27 = vsub.f32 %v1729_v20, %v1740_v25  ;;  %v1745_v5 = vsel %vm913_vm2, %v1743_v26, 0.0 }
 0xbc3   : > { %1746 = vadd.xlane.f32.xlu1 %v1745_v5  ;;  %v2337_v5 = vld [vmem:[%s868_s29] ss:$0 sm:$0xff] }
 0xbc4   : > { %v1744_v28 = vmul.f32 %v1742_v27, %v1742_v27 }
 0xbc6   : > { %v1748_v6 = vsel %vm913_vm2, %v1744_v28, 0.0 }
 0xbc7   : > { %1749 = vadd.xlane.f32.xlu1 %v1748_v6  ;;  %v2338_v6 = vld [vmem:[%s871_s18] ss:$0 sm:$0xff] }
 0xc50   : > { %v1747_v33 = vpop.xlane.xlu1 %1746 }
 0xc51   : > { %v1751_v34 = vmul.f32 0.03125, %v1747_v33 }
 0xc53   : > { %v1753_v35 = vadd.f32 1e-05, %v1751_v34 }
 0xc54   : > { %v1750_v36 = vpop.xlane.xlu1 %1749 }
 0xc55   : > { %2676 = vrsqrt.f32 %v1753_v35  ;;  %v1752_v37 = vmul.f32 0.03125, %v1750_v36 }
 0xc57   : > { %v1754_v38 = vadd.f32 1e-05, %v1752_v37 }
 0xc59   : > { %2678 = vrsqrt.f32 %v1754_v38 }
 0xc5f   : > { %v2677_v39 = vpop.eup %2676 }
 0xc60   : > { %v1757_v40 = vmul.f32 %v2677_v39, %v1741_v23 }
 0xc62   : > { %v1765_v43 = vmul.f32 %v2325_v41, %v1757_v40 }
 0xc63   : > { %v2679_v42 = vpop.eup %2678 }
 0xc64   : > { %v1758_v44 = vmul.f32 %v2679_v42, %v1742_v27  ;;  %v1773_v47 = vadd.f32 %v2326_v45, %v1765_v43 }
 0xc66   : > { %v1766_v46 = vmul.f32 %v2325_v41, %v1758_v44 }
 0xc68   : > { %v1774_v48 = vadd.f32 %v2326_v45, %v1766_v46 }
 0xc6a   : > { %v1775_v50 = vpack.c.bf16 %v1774_v48, %v1773_v47 }
 0xc6c   : > { %2484 = vmatmul.mubr.msk.bf16.vlgmr.msra.gmra.mrb[28].mxu0 %vm913_vm2, %v1775_v50 }
 0xd3f   : > { %v1847_v56 = vpop.f32.mrb[28].mxu0 }
 0xd40   : > { %v1848_v57 = vadd.f32 %v2327_v55, %v1847_v56  ;;  %v2485_v58 = vpop.f32.mrb[29].mxu0 }
 0xd41   : > { %v1850_v59 = vpop.f32.mrb[30].mxu0 }
 0xd42   : > { %v1851_v60 = vadd.f32 %v2327_v55, %v1850_v59  ;;  %v2486_v61 = vpop.f32.mrb[31].mxu0  ;;  %v1854_v51 = vmax.f32 %v1848_v57, 0.0 }
 0xd44   : > { %v1855_v62 = vmax.f32 %v1851_v60, 0.0 }
 0xd46   : > { %v1856_v63 = vpack.c.bf16 %v1855_v62, %v1854_v51 }
 0xd48   : > { %2496 = vmatmul.mubr.msk.bf16.vlgmr.msra.gmra.mrb[28].mxu1 %vm1887_vm6, %v1856_v63 }
 0xe1b   : > { %v1925_v0 = vpop.f32.mrb[28].mxu1 }
 0xe1c   : > { %v1926_v1 = vadd.f32 %v2331_v3, %v1925_v0  ;;  %v2497_v49 = vpop.f32.mrb[29].mxu1 }
 0xe1d   : > { %v1928_v53 = vpop.f32.mrb[30].mxu1 }
 0xe1e   : > { %v1929_v2 = vadd.f32 %v2331_v3, %v1928_v53  ;;  %v2498_v4 = vpop.f32.mrb[31].mxu1  ;;  %v1932_v7 = vadd.f32 %v1926_v1, %v1773_v47 }
 0xe20   : > { %v1934_v8 = vsel %vm913_vm2, %v1932_v7, 0.0  ;;  %v1933_v9 = vadd.f32 %v1929_v2, %v1774_v48 }
 0xe21   : > { %1935 = vadd.xlane.f32.xlu1 %v1934_v8 }
 0xe22   : > { %v1937_v10 = vsel %vm913_vm2, %v1933_v9, 0.0 }
 0xe25   : > { %1938 = vadd.xlane.f32.xlu1 %v1937_v10 }
 0xeae   : > { %v1936_v11 = vpop.xlane.xlu1 %1935 }
 0xeaf   : > { %v1940_v12 = vmul.f32 0.03125, %v1936_v11 }
 0xeb1   : > { %v1942_v13 = vsub.f32 %v1932_v7, %v1940_v12 }
 0xeb2   : > { %v1939_v14 = vpop.xlane.xlu1 %1938 }
 0xeb3   : > { %v1941_v15 = vmul.f32 0.03125, %v1939_v14  ;;  %v1944_v16 = vmul.f32 %v1942_v13, %v1942_v13 }
 0xeb5   : > { %v1943_v17 = vsub.f32 %v1933_v9, %v1941_v15  ;;  %v1946_v18 = vsel %vm913_vm2, %v1944_v16, 0.0 }
 0xeb6   : > { %1947 = vadd.xlane.f32.xlu0 %v1946_v18 }
 0xeb7   : > { %v1945_v20 = vmul.f32 %v1943_v17, %v1943_v17 }
 0xeb9   : > { %v1949_v21 = vsel %vm913_vm2, %v1945_v20, 0.0 }
 0xeba   : > { %1950 = vadd.xlane.f32.xlu1 %v1949_v21 }
 0xf43   : > { %v1948_v22 = vpop.xlane.xlu0 %1947 }
 0xf44   : > { %v1952_v19 = vmul.f32 0.03125, %v1948_v22 }
 0xf46   : > { %v1954_v23 = vadd.f32 1e-05, %v1952_v19 }
 0xf47   : > { %v1951_v24 = vpop.xlane.xlu1 %1950 }
 0xf48   : > { %2680 = vrsqrt.f32 %v1954_v23  ;;  %v1953_v25 = vmul.f32 0.03125, %v1951_v24 }
 0xf4a   : > { %v1955_v26 = vadd.f32 1e-05, %v1953_v25 }
 0xf4c   : > { %2682 = vrsqrt.f32 %v1955_v26 }
 0xf52   : > { %v2681_v27 = vpop.eup %2680 }
 0xf53   : > { %v1958_v28 = vmul.f32 %v2681_v27, %v1942_v13 }
 0xf55   : > { %v1966_v29 = vmul.f32 %v2337_v5, %v1958_v28 }
 0xf56   : > { %v2683_v30 = vpop.eup %2682 }
 0xf57   : > { %v1974_v31 = vadd.f32 %v2338_v6, %v1966_v29  ;;  %v1959_v32 = vmul.f32 %v2683_v30, %v1943_v17  ;;  %1981 = sbr.rel (%p2339_p7) target bundleno = 3942 (0xf66), region = 112 }
 0xf59   : > { %1976 = vst.msk [vmem:[#allocation2] sm:$0xff] %vm913_vm2, %v1974_v31  ;;  %v1967_v33 = vmul.f32 %v2337_v5, %v1959_v32 }
 0xf5b   : > { %v1975_v34 = vadd.f32 %v2338_v6, %v1967_v33 }
 0xf5d   : > { %1977 = vst.msk [vmem:[#allocation2 + $0x8] sm:$0xff] %vm913_vm2, %v1975_v34 }
 0xf60   : > { %v1982_v35 = vld [vmem:[#allocation2] sm:$0xff] }
 0xf61   : > { %1984 = vst.msk [vmem:[%s3452_s19] sm:$0xff] %vm913_vm2, %v1982_v35 }
 0xf64   : > { %v1983_v36 = vld [vmem:[#allocation2 + $0x8] sm:$0xff] }
 0xf65   : > { %1985 = vst.msk [vmem:[%s3452_s19 + $0x8] sm:$0xff] %vm913_vm2, %v1983_v36 }
 0xf66 PF: > { %s3851_s29 = sld [smem:[#allocation22_spill]]  ;;  %s3852_s14 = sld [smem:[#allocation18_spill]] }
 0xf67   : > { %s3853_s18 = sld [smem:[#allocation30_spill]]  ;;  %s3854_s3 = sld [smem:[#allocation48_spill]] }
 0xf68   : > { %s2000_s27 = sshll.u32 %s3452_s19, 4  ;;  %s2982_s12 = smov [#allocation12]   ;;  %s3665_s27 = int_to_ptr.vmem [resolvable:$true] %s2000_s27 }
 0xf69   : > { %s2834_s15 = scalar_lea.vmem %s3665_s27, 256  ;;  %s2838_s25 = sshll.u32 %s2982_s12, 4  ;;  %s2839_s25 = int_to_ptr.vmem [resolvable:$false] %s2838_s25 }
 0xf6a   : > { %p2835_p10 = scmp.ne.s32.totalorder %s3665_s27, %s2834_s15  ;;  %s2840_s10 = scalar_lea.vmem %s2839_s25, 512 }
 0xf6b   : > { %p2841_p4 = scmp.lt.s32.totalorder %s3665_s27, %s2839_s25  ;;  %p2842_p8 = scmp.lt.s32.totalorder %s2840_s10, %s2834_s15 }
 0xf6c   : > { %s2352_s8 = sshll.u32 %s3851_s29, 8  ;;  %s3855_s9 = sand.u32 1, %s3852_s14  }
 0xf6d   : > { %s3662_s7 = scalar_lea.hbm %s3854_s3, %s2352_s8  ;;  %s3669_s5 = scalar_lea.sflag [#allocation5], %s3855_s9 }
 0xf6e   : > { %p3856_p3 = scmp.ne.s32.totalorder %s3853_s18, 0  ;;  %p2843_p0 = por %p2842_p8, %p2841_p4 }
 0xf70   : > { %p2836_p11 = pnand %p2835_p10, %p3856_p3 }
 0xf72   : > { %p2837_p5 = pneg %p2836_p11 }
 0xf74   : > { %p2844_p1 = pnand %p2843_p0, %p2837_p5 }
 0xf76   : > { %2847 = shalt.err (!%p2844_p1)
}
 0xf77   : > { %s2848_s19 = scalar_lea.hbm %s3662_s7, 256  ;;  %s2852_s28 = scalar_lea.hbm %s3854_s3, 512 }
 0xf78   : > { %p2849_p9 = scmp.ne.s32.totalorder %s3662_s7, %s2848_s19  ;;  %p2853_p2 = scmp.lt.u32.totalorder %s3662_s7, %s3854_s3 }
 0xf79   : > { %p2854_p13 = scmp.lt.u32.totalorder %s2852_s28, %s2848_s19  ;;  %p2856_p10 = scmp.lt.u32.totalorder %s2848_s19, %s3662_s7 }
 0xf7a   : > { %p2850_p6 = pnand %p2849_p9, %p3856_p3 }
 0xf7b   : > { %p2855_p7 = por %p2854_p13, %p2853_p2 }
 0xf7c   : > { %p2851_p12 = pneg %p2850_p6 }
 0xf7d   : > { %p2857_p11 = por %p2856_p10, %p2855_p7 }
 0xf7f   : > { %p2858_p5 = pnand %p2857_p11, %p2851_p12 }
 0xf81   : > { %2861 = shalt.err (!%p2858_p5)
}
 0xf82   : > { %s2983_s17 = smov 128   ;;  %s2984_s23 = smov 8  }
 0xf83   : > { %2509 = dma.vmem_to_hbm [thread:$0]  (%p3856_p3), %s3665_s27, 256, %s3662_s7, %s3669_s5, %s2983_s17, %s2983_s17, %s2984_s23  }
 0xf84 PF: > { %s3857_s0 = sld [smem:[#allocation25_spill]]  ;;  %s3858_s21 = sld [smem:[#allocation17_spill]] }
 0xf85   : > { %s3859_s22 = sld [smem:[#allocation31_spill]] }
 0xf8a   : > { %p2532_p4 = scmp.ge.s32.totalorder %s3857_s0, 2  ;;  %s2015_s24 = sand.u32 1, %s3858_s21  }
 0xf8b   : > { %p3860_p8 = scmp.ne.s32.totalorder %s3859_s22, 0  ;;  %s2016_s2 = scalar_lea.sflag [#allocation5], %s2015_s24 }
 0xf8d   : > { %p2528_p0 = pnand %p2532_p4, %p3860_p8 }
 0xf8f   : > { %2919 = dma.done.wait (!%p2528_p0), %s2016_s2, 256  }
 0xf90   : > { %2921 = vsyncadd (!%p2528_p0), %s2016_s2, 4294967040  ;;  %s38_s0 = sadd.s32 1, %s3857_s0   ;;  %s3861_s21 = sld [smem:[#allocation18_spill]] }
 0xf91   : > { %p35_p1 = scmp.ge.s32.totalorder %s38_s0, 6   ;;  %s3862_s22 = sld [smem:[#allocation19_spill]] }
 0xf92   : > { %s3863_s23 = sld [smem:[#allocation29_spill]]  ;;  %s3864_s24 = sld [smem:[#allocation20_spill]] }
 0xf93   : > { %s3865_s25 = sld [smem:[#allocation21_spill]]  ;;  %s3866_s26 = sld [smem:[#allocation28_spill]] }
 0xf94   : > { %s3867_s27 = sld [smem:[#allocation23_spill]]  ;;  %s3868_s28 = sld [smem:[#allocation24_spill]] }
 0xf95   : > { %s3869_s29 = sld [smem:[#allocation26_spill]]  ;;  %s3870_s30 = sld [smem:[#allocation27_spill]] }
 0xf96   :  { %37 = sbr.rel (!%p35_p1) target bundleno = 31 (0x1f), region = 218 }
 0xf9d   :  { %2021 = vsyncpa [#allocation4], 1 }
 0xf9e   :  { %2023 = vsyncpa [#allocation4 + $0x1], 1 }
 0xf9f   :  { %2024 = vsyncpa [#allocation7], 1 }
 0xfa0   :  { %2026 = vsyncpa [#allocation7 + $0x1], 1 }
 0xfa1   :  { %2027 = vsyncpa [#allocation10], 1 }
 0xfa2   :  { %2029 = vsyncpa [#allocation10 + $0x1], 1 }
 0xfa3   :  { %2030 = vsyncpa [#allocation5], 1 }
 0xfa4   :  { %2032 = vsyncpa [#allocation5 + $0x1], 1 }

</bundles_post_ra>
